<compile_context>
chip_gen: v6e
topology: v6e:2x2x1
jax: 0.10.0
libtpu: 0.0.40
codegen_flags: <defaults>
</compile_context>

<pallas_src>
import functools

import jax
import jax.numpy as jnp
from jax import lax
from jax.experimental import pallas as pl
from jax.experimental.pallas import tpu as pltpu


def _dw_res_block_kernel(x_ref, wdw1_ref, wdw2_ref, mask_ref,
                         w1_ref, b1_ref, a_ref, w2_ref, b2_ref,
                         o_ref, *, C, H, W, K, pad, bt):
    """Fused DWResidualBlock forward for `bt` images (channels folded onto sublanes).

    x_ref    : (bt*C, H*W)     VMEM  flattened NCHW rows for this grid step (lane-dense)
    wdw1_ref : (K*K, bt*C, 1)  VMEM  per-row depthwise tap weights, stage 1
    wdw2_ref : (K*K, bt*C, 1)  VMEM  per-row depthwise tap weights, stage 2
    mask_ref : (K*K, 1, H*W)   VMEM  per-tap validity masks (implement zero padding)
    w1_ref   : (C, C)          SMEM  1x1 weights, stage 1 (BN1 folded in)
    b1_ref   : (C,)            SMEM  fused bias, stage 1 (dw bias + 1x1 bias + BN1)
    a_ref    : (1,)            SMEM  PReLU slope (single shared parameter)
    w2_ref   : (C, C)          SMEM  1x1 weights, stage 2 (BN2 folded in)
    b2_ref   : (C,)            SMEM  fused bias, stage 2
    o_ref    : (bt*C, H*W)     VMEM  output rows (lane-dense, unmasked stores)
    """
    HW = H * W
    KK = K * K
    R = bt * C
    f32 = jnp.float32

    x = x_ref[...].astype(f32)                          # (R, HW)

    # Hoist the (1, HW) tap masks once; they are shared by both depthwise stages.
    masks = [mask_ref[t] for t in range(KK)]

    def dwconv(v, wdw_ref):
        # 3x3 depthwise "same" conv on the flattened row-major spatial axis.
        # For tap (kh, kw) the flat source offset is d = (kh-pad)*W + (kw-pad):
        #     out[p] += w[row] * mask_t[p] * v[p + d]
        # pltpu.roll follows np.roll semantics (roll(v, s)[p] = v[(p - s) mod HW]),
        # so shift s = (-d) mod HW yields v[(p + d) mod HW]; the wrapped / out-of-image
        # positions are zeroed by mask_t, which is exactly zero padding.
        acc = None
        for t in range(KK):
            kh, kw = divmod(t, K)
            d = (kh - pad) * W + (kw - pad)
            shifted = v if d == 0 else pltpu.roll(v, shift=(-d) % HW, axis=1)
            if kh == pad and kw == pad:
                tap = shifted                            # centre tap: always in-bounds
            else:
                tap = shifted * masks[t]                 # (R,HW) * (1,HW)
            contrib = wdw_ref[t] * tap                   # (R,1) per-row weight * (R,HW)
            acc = contrib if acc is None else acc + contrib
        return acc

    def pointwise(v, w_ref, b_ref):
        # 1x1 conv (channel mix) as scalar-broadcast FMAs on the VPU; at C=4 the MXU
        # would be >96% idle, so it is skipped on purpose (see TODO for large C).
        rows = []
        for r in range(R):
            img, co = divmod(r, C)
            y = b_ref[co] + w_ref[co, 0] * v[img * C:img * C + 1, :]
            for ci in range(1, C):
                y = y + w_ref[co, ci] * v[img * C + ci:img * C + ci + 1, :]
            rows.append(y)
        return jnp.concatenate(rows, axis=0)             # (R, HW)

    a = a_ref[0]

    # stage 1: depthwise 3x3 -> 1x1 (+BN1 folded) -> PReLU
    y = pointwise(dwconv(x, wdw1_ref), w1_ref, b1_ref)
    y = jnp.where(y >= 0.0, y, a * y)

    # stage 2: depthwise 3x3 -> 1x1 (+BN2 folded) -> residual add
    y = pointwise(dwconv(y, wdw2_ref), w2_ref, b2_ref)
    o_ref[...] = (y + x).astype(o_ref.dtype)             # lane-dense (HW-wide) store


def _pick_batch_tile(B, C, H, W, itemsize):
    """Images per grid step.

    * Tiny problems: one grid step (per-step overhead ~0.35us dominates) and folding B
      onto the sublane axis fills the 8-sublane vregs when C < 8.   (v5e/v6e feedback)
    * Larger problems: keep >= 2 'parallel' grid steps so both v7x TensorCores get work,
      while staying well inside the scoped-VMEM budget.                 (v7x feedback)
    """
    per_image = C * H * W * itemsize
    if B * per_image <= 256 * 1024:
        return B
    budget = 2 * 1024 * 1024
    bt = max(1, min(B // 2, budget // max(per_image, 1)))
    while bt > 1 and (B % bt != 0 or (bt * C) % 8 != 0):
        bt -= 1
    if B % bt != 0 or ((bt * C) % 8 != 0 and bt != B):
        bt = B   # TODO(synk): pad C up to a multiple of 8 instead of one big block here.
    return bt


def dw_residual_block_pallas(x, params, *, eps=1e-5, batch_tile=None):
    """Forward pass of DWResidualBlock (inference-mode BatchNorm). NCHW in / NCHW out."""
    B, C, H, W = x.shape
    K = params["w_dw1"].shape[-1]
    pad = (K - 1) // 2                     # module: kernel_size=3, stride=1, padding=1
    HW = H * W
    KK = K * K
    f32 = jnp.float32

    bt = _pick_batch_tile(B, C, H, W, x.dtype.itemsize) if batch_tile is None else batch_tile
    assert B % bt == 0, (B, bt)
    R = bt * C
    nb = B // bt

    def fuse_stage(w_dw, b_dw, w_pw, b_pw, gamma, beta, mean, var):
        # Depthwise tap table (C, K*K) row-major over (kh, kw), tiled per image in the
        # block and laid out as a (K*K, bt*C, 1) column table for per-row broadcasting.
        wdw_tab = w_dw[:, 0].reshape(C, KK).astype(f32)
        wdw_col = jnp.transpose(jnp.tile(wdw_tab, (bt, 1)))[:, :, None]      # (KK, R, 1)
        # Fold depthwise bias, 1x1 bias and (eval) BatchNorm into the 1x1 conv:
        #   BN( Wpw @ (dw(x) + b_dw) + b_pw ) = (s*Wpw) @ dw(x) + [s*(Wpw@b_dw + b_pw - mean) + beta]
        s = gamma.astype(f32) / jnp.sqrt(var.astype(f32) + eps)
        w_pw2d = w_pw[:, :, 0, 0].astype(f32)                                # (Cout, Cin)
        w_f = s[:, None] * w_pw2d
        b_f = s * (w_pw2d @ b_dw.astype(f32) + b_pw.astype(f32)
                   - mean.astype(f32)) + beta.astype(f32)
        return wdw_col, w_f, b_f

    wdw1, w1f, b1f = fuse_stage(params["w_dw1"], params["b_dw1"],
                                params["w_pw1"], params["b_pw1"],
                                params["bn1_gamma"], params["bn1_beta"],
                                params["bn1_mean"], params["bn1_var"])
    wdw2, w2f, b2f = fuse_stage(params["w_dw2"], params["b_dw2"],
                                params["w_pw2"], params["b_pw2"],
                                params["bn2_gamma"], params["bn2_beta"],
                                params["bn2_mean"], params["bn2_var"])
    a_prelu = jnp.reshape(params["prelu_a"].astype(f32), (1,))

    # Per-tap validity masks over the flattened spatial axis: position p=(i,j) keeps tap
    # (kh,kw) iff the source pixel (i+kh-pad, j+kw-pad) lies inside the image.  These make
    # the in-kernel circular lane shifts equivalent to a zero-padded "same" convolution.
    rows_idx = jnp.arange(H)[:, None]
    cols_idx = jnp.arange(W)[None, :]
    mask_list = []
    for t in range(KK):
        kh, kw = divmod(t, K)
        valid = ((rows_idx + kh - pad >= 0) & (rows_idx + kh - pad < H) &
                 (cols_idx + kw - pad >= 0) & (cols_idx + kw - pad < W))
        mask_list.append(valid.reshape(1, 1, HW))
    masks = jnp.concatenate(mask_list, axis=0).astype(f32)                   # (KK, 1, HW)

    # Free reshape (identical row-major bytes, still NCHW): puts H*W on the lane axis so
    # every load / FMA / store is lane-dense even when W < 128.
    x_flat = x.reshape(B * C, HW)

    kernel = functools.partial(_dw_res_block_kernel,
                               C=C, H=H, W=W, K=K, pad=pad, bt=bt)
    smem = pl.BlockSpec(memory_space=pltpu.MemorySpace.SMEM)   # tiny constants -> SMEM

    out_flat = pl.pallas_call(
        kernel,
        out_shape=jax.ShapeDtypeStruct((B * C, HW), x.dtype),
        grid=(nb,),
        in_specs=[
            pl.BlockSpec((R, HW), lambda b: (b, 0)),            # x rows for this step
            pl.BlockSpec((KK, R, 1), lambda b: (0, 0, 0)),      # stage-1 dw tap columns
            pl.BlockSpec((KK, R, 1), lambda b: (0, 0, 0)),      # stage-2 dw tap columns
            pl.BlockSpec((KK, 1, HW), lambda b: (0, 0, 0)),     # tap validity masks
            smem, smem, smem, smem, smem,                       # w1, b1, prelu_a, w2, b2
        ],
        out_specs=pl.BlockSpec((R, HW), lambda b: (b, 0)),
        compiler_params=pltpu.CompilerParams(dimension_semantics=("parallel",)),
    )(x_flat, wdw1, wdw2, masks, w1f, b1f, a_prelu, w2f, b2f)

    return out_flat.reshape(B, C, H, W)


def _reference(x, params, *, eps=1e-5):
    """Pure-JAX reference matching the PyTorch module (eval-mode BatchNorm)."""
    C = x.shape[1]

    def dwconv(v, w_dw, b_dw, w_pw, b_pw):
        y = lax.conv_general_dilated(
            v, w_dw, window_strides=(1, 1), padding=((1, 1), (1, 1)),
            feature_group_count=C, dimension_numbers=("NCHW", "OIHW", "NCHW"))
        y = y + b_dw[None, :, None, None]
        z = lax.conv_general_dilated(
            y, w_pw, window_strides=(1, 1), padding=((0, 0), (0, 0)),
            dimension_numbers=("NCHW", "OIHW", "NCHW"))
        return z + b_pw[None, :, None, None]

    def bn(v, g, b, m, var):
        inv = g / jnp.sqrt(var + eps)
        return (v - m[None, :, None, None]) * inv[None, :, None, None] + b[None, :, None, None]

    y = dwconv(x, params["w_dw1"], params["b_dw1"], params["w_pw1"], params["b_pw1"])
    y = bn(y, params["bn1_gamma"], params["bn1_beta"], params["bn1_mean"], params["bn1_var"])
    y = jnp.where(y >= 0, y, params["prelu_a"] * y)
    y = dwconv(y, params["w_dw2"], params["b_dw2"], params["w_pw2"], params["b_pw2"])
    y = bn(y, params["bn2_gamma"], params["bn2_beta"], params["bn2_mean"], params["bn2_var"])
    return y + x


if __name__ == "__main__":
    B, C, H, W, K = 2, 4, 16, 16, 3

    key = jax.random.PRNGKey(0)
    ks = jax.random.split(key, 20)

    x = jax.random.normal(ks[0], (B, C, H, W), dtype=jnp.float32)

    params = dict(
        # DWConv2d #1 (inside DWConv2dBNPReluBlock)
        w_dw1=jax.random.normal(ks[1], (C, 1, K, K), jnp.float32) * 0.2,
        b_dw1=jax.random.normal(ks[2], (C,), jnp.float32) * 0.1,
        w_pw1=jax.random.normal(ks[3], (C, C, 1, 1), jnp.float32) * 0.2,
        b_pw1=jax.random.normal(ks[4], (C,), jnp.float32) * 0.1,
        # BatchNorm2d #1 (running statistics, eval-mode forward)
        bn1_gamma=1.0 + 0.1 * jax.random.normal(ks[5], (C,), jnp.float32),
        bn1_beta=0.1 * jax.random.normal(ks[6], (C,), jnp.float32),
        bn1_mean=0.1 * jax.random.normal(ks[7], (C,), jnp.float32),
        bn1_var=jnp.abs(jax.random.normal(ks[8], (C,), jnp.float32)) + 0.5,
        # PReLU (single learnable slope, PyTorch default init 0.25)
        prelu_a=jnp.asarray([0.25], jnp.float32),
        # DWConv2d #2
        w_dw2=jax.random.normal(ks[9], (C, 1, K, K), jnp.float32) * 0.2,
        b_dw2=jax.random.normal(ks[10], (C,), jnp.float32) * 0.1,
        w_pw2=jax.random.normal(ks[11], (C, C, 1, 1), jnp.float32) * 0.2,
        b_pw2=jax.random.normal(ks[12], (C,), jnp.float32) * 0.1,
        # BatchNorm2d #2
        bn2_gamma=1.0 + 0.1 * jax.random.normal(ks[13], (C,), jnp.float32),
        bn2_beta=0.1 * jax.random.normal(ks[14], (C,), jnp.float32),
        bn2_mean=0.1 * jax.random.normal(ks[15], (C,), jnp.float32),
        bn2_var=jnp.abs(jax.random.normal(ks[16], (C,), jnp.float32)) + 0.5,
    )

    out = dw_residual_block_pallas(x, params)
    out = jax.block_until_ready(out)

    ref = _reference(x, params)
    assert out.shape == (B, C, H, W), out.shape
    max_err = float(jnp.max(jnp.abs(out - ref)))
    assert jnp.allclose(out, ref, atol=1e-4, rtol=1e-4), f"mismatch vs reference: {max_err}"

    print("KERNEL_OK")
</pallas_src>

<mosaic_0001>
module attributes {stable_mosaic.version = 11 : i64} {
  func.func @_dw_res_block_kernel(%arg0: i32, %arg1: memref<8x256xf32, #tpu.memory_space<vmem>>, %arg2: memref<9x8x1xf32, #tpu.memory_space<vmem>>, %arg3: memref<9x8x1xf32, #tpu.memory_space<vmem>>, %arg4: memref<9x1x256xf32, #tpu.memory_space<vmem>>, %arg5: memref<4x4xf32, #tpu.memory_space<smem>>, %arg6: memref<4xf32, #tpu.memory_space<smem>>, %arg7: memref<1xf32, #tpu.memory_space<smem>>, %arg8: memref<4x4xf32, #tpu.memory_space<smem>>, %arg9: memref<4xf32, #tpu.memory_space<smem>>, %arg10: memref<8x256xf32, #tpu.memory_space<vmem>>) attributes {dimension_semantics = [#tpu.dimension_semantics<parallel>], iteration_bounds = array<i64: 1>, scalar_prefetch = 0 : i64, scratch_operands = 0 : i64, tpu.core_type = #tpu.core_type<tc>, window_params = [{transform_indices = @transform_0, window_bounds = array<i64: 8, 256>}, {pipeline_mode = #tpu.pipeline_mode<synchronous>, transform_indices = @transform_1, window_bounds = array<i64: 9, 8, 1>}, {pipeline_mode = #tpu.pipeline_mode<synchronous>, transform_indices = @transform_2, window_bounds = array<i64: 9, 8, 1>}, {pipeline_mode = #tpu.pipeline_mode<synchronous>, transform_indices = @transform_3, window_bounds = array<i64: 9, 1, 256>}, {transform_indices = @transform_4, window_bounds = array<i64: 4, 4>}, {transform_indices = @transform_5, window_bounds = array<i64: 4>}, {transform_indices = @transform_6, window_bounds = array<i64: 1>}, {transform_indices = @transform_7, window_bounds = array<i64: 4, 4>}, {transform_indices = @transform_8, window_bounds = array<i64: 4>}, {transform_indices = @transform_9, window_bounds = array<i64: 8, 256>}]} {
    %c0 = arith.constant 0 : index
    %c0_0 = arith.constant 0 : index
    %0 = vector.load %arg1[%c0, %c0_0] : memref<8x256xf32, #tpu.memory_space<vmem>>, vector<8x256xf32>
    %c0_1 = arith.constant 0 : index
    %c0_2 = arith.constant 0 : index
    %c0_3 = arith.constant 0 : index
    %1 = vector.load %arg4[%c0_1, %c0_2, %c0_3] : memref<9x1x256xf32, #tpu.memory_space<vmem>>, vector<1x1x256xf32>
    %2 = vector.shape_cast %1 : vector<1x1x256xf32> to vector<1x256xf32>
    %c1 = arith.constant 1 : index
    %c0_4 = arith.constant 0 : index
    %c0_5 = arith.constant 0 : index
    %3 = vector.load %arg4[%c1, %c0_4, %c0_5] : memref<9x1x256xf32, #tpu.memory_space<vmem>>, vector<1x1x256xf32>
    %4 = vector.shape_cast %3 : vector<1x1x256xf32> to vector<1x256xf32>
    %c2 = arith.constant 2 : index
    %c0_6 = arith.constant 0 : index
    %c0_7 = arith.constant 0 : index
    %5 = vector.load %arg4[%c2, %c0_6, %c0_7] : memref<9x1x256xf32, #tpu.memory_space<vmem>>, vector<1x1x256xf32>
    %6 = vector.shape_cast %5 : vector<1x1x256xf32> to vector<1x256xf32>
    %c3 = arith.constant 3 : index
    %c0_8 = arith.constant 0 : index
    %c0_9 = arith.constant 0 : index
    %7 = vector.load %arg4[%c3, %c0_8, %c0_9] : memref<9x1x256xf32, #tpu.memory_space<vmem>>, vector<1x1x256xf32>
    %8 = vector.shape_cast %7 : vector<1x1x256xf32> to vector<1x256xf32>
    %c5 = arith.constant 5 : index
    %c0_10 = arith.constant 0 : index
    %c0_11 = arith.constant 0 : index
    %9 = vector.load %arg4[%c5, %c0_10, %c0_11] : memref<9x1x256xf32, #tpu.memory_space<vmem>>, vector<1x1x256xf32>
    %10 = vector.shape_cast %9 : vector<1x1x256xf32> to vector<1x256xf32>
    %c6 = arith.constant 6 : index
    %c0_12 = arith.constant 0 : index
    %c0_13 = arith.constant 0 : index
    %11 = vector.load %arg4[%c6, %c0_12, %c0_13] : memref<9x1x256xf32, #tpu.memory_space<vmem>>, vector<1x1x256xf32>
    %12 = vector.shape_cast %11 : vector<1x1x256xf32> to vector<1x256xf32>
    %c7 = arith.constant 7 : index
    %c0_14 = arith.constant 0 : index
    %c0_15 = arith.constant 0 : index
    %13 = vector.load %arg4[%c7, %c0_14, %c0_15] : memref<9x1x256xf32, #tpu.memory_space<vmem>>, vector<1x1x256xf32>
    %14 = vector.shape_cast %13 : vector<1x1x256xf32> to vector<1x256xf32>
    %c8 = arith.constant 8 : index
    %c0_16 = arith.constant 0 : index
    %c0_17 = arith.constant 0 : index
    %15 = vector.load %arg4[%c8, %c0_16, %c0_17] : memref<9x1x256xf32, #tpu.memory_space<vmem>>, vector<1x1x256xf32>
    %16 = vector.shape_cast %15 : vector<1x1x256xf32> to vector<1x256xf32>
    %c0_18 = arith.constant 0 : index
    %17 = memref.load %arg7[%c0_18] : memref<1xf32, #tpu.memory_space<smem>>
    %c17_i32 = arith.constant 17 : i32
    %18 = tpu.dynamic_rotate %0 by %c17_i32 dim 1 : vector<8x256xf32>, i32 -> vector<8x256xf32>
    %19 = vector.broadcast %2 : vector<1x256xf32> to vector<8x256xf32>
    %20 = arith.mulf %18, %19 : vector<8x256xf32>
    %c0_19 = arith.constant 0 : index
    %c0_20 = arith.constant 0 : index
    %c0_21 = arith.constant 0 : index
    %21 = vector.load %arg2[%c0_19, %c0_20, %c0_21] : memref<9x8x1xf32, #tpu.memory_space<vmem>>, vector<1x8x1xf32>
    %22 = vector.shape_cast %21 : vector<1x8x1xf32> to vector<8x1xf32>
    %23 = vector.broadcast %22 : vector<8x1xf32> to vector<8x256xf32>
    %24 = arith.mulf %23, %20 : vector<8x256xf32>
    %c16_i32 = arith.constant 16 : i32
    %25 = tpu.dynamic_rotate %0 by %c16_i32 dim 1 : vector<8x256xf32>, i32 -> vector<8x256xf32>
    %26 = vector.broadcast %4 : vector<1x256xf32> to vector<8x256xf32>
    %27 = arith.mulf %25, %26 : vector<8x256xf32>
    %c1_22 = arith.constant 1 : index
    %c0_23 = arith.constant 0 : index
    %c0_24 = arith.constant 0 : index
    %28 = vector.load %arg2[%c1_22, %c0_23, %c0_24] : memref<9x8x1xf32, #tpu.memory_space<vmem>>, vector<1x8x1xf32>
    %29 = vector.shape_cast %28 : vector<1x8x1xf32> to vector<8x1xf32>
    %30 = vector.broadcast %29 : vector<8x1xf32> to vector<8x256xf32>
    %31 = arith.mulf %30, %27 : vector<8x256xf32>
    %32 = arith.addf %24, %31 : vector<8x256xf32>
    %c15_i32 = arith.constant 15 : i32
    %33 = tpu.dynamic_rotate %0 by %c15_i32 dim 1 : vector<8x256xf32>, i32 -> vector<8x256xf32>
    %34 = vector.broadcast %6 : vector<1x256xf32> to vector<8x256xf32>
    %35 = arith.mulf %33, %34 : vector<8x256xf32>
    %c2_25 = arith.constant 2 : index
    %c0_26 = arith.constant 0 : index
    %c0_27 = arith.constant 0 : index
    %36 = vector.load %arg2[%c2_25, %c0_26, %c0_27] : memref<9x8x1xf32, #tpu.memory_space<vmem>>, vector<1x8x1xf32>
    %37 = vector.shape_cast %36 : vector<1x8x1xf32> to vector<8x1xf32>
    %38 = vector.broadcast %37 : vector<8x1xf32> to vector<8x256xf32>
    %39 = arith.mulf %38, %35 : vector<8x256xf32>
    %40 = arith.addf %32, %39 : vector<8x256xf32>
    %c1_i32 = arith.constant 1 : i32
    %41 = tpu.dynamic_rotate %0 by %c1_i32 dim 1 : vector<8x256xf32>, i32 -> vector<8x256xf32>
    %42 = vector.broadcast %8 : vector<1x256xf32> to vector<8x256xf32>
    %43 = arith.mulf %41, %42 : vector<8x256xf32>
    %c3_28 = arith.constant 3 : index
    %c0_29 = arith.constant 0 : index
    %c0_30 = arith.constant 0 : index
    %44 = vector.load %arg2[%c3_28, %c0_29, %c0_30] : memref<9x8x1xf32, #tpu.memory_space<vmem>>, vector<1x8x1xf32>
    %45 = vector.shape_cast %44 : vector<1x8x1xf32> to vector<8x1xf32>
    %46 = vector.broadcast %45 : vector<8x1xf32> to vector<8x256xf32>
    %47 = arith.mulf %46, %43 : vector<8x256xf32>
    %48 = arith.addf %40, %47 : vector<8x256xf32>
    %c4 = arith.constant 4 : index
    %c0_31 = arith.constant 0 : index
    %c0_32 = arith.constant 0 : index
    %49 = vector.load %arg2[%c4, %c0_31, %c0_32] : memref<9x8x1xf32, #tpu.memory_space<vmem>>, vector<1x8x1xf32>
    %50 = vector.shape_cast %49 : vector<1x8x1xf32> to vector<8x1xf32>
    %51 = vector.broadcast %50 : vector<8x1xf32> to vector<8x256xf32>
    %52 = arith.mulf %51, %0 : vector<8x256xf32>
    %53 = arith.addf %48, %52 : vector<8x256xf32>
    %c255_i32 = arith.constant 255 : i32
    %54 = tpu.dynamic_rotate %0 by %c255_i32 dim 1 : vector<8x256xf32>, i32 -> vector<8x256xf32>
    %55 = vector.broadcast %10 : vector<1x256xf32> to vector<8x256xf32>
    %56 = arith.mulf %54, %55 : vector<8x256xf32>
    %c5_33 = arith.constant 5 : index
    %c0_34 = arith.constant 0 : index
    %c0_35 = arith.constant 0 : index
    %57 = vector.load %arg2[%c5_33, %c0_34, %c0_35] : memref<9x8x1xf32, #tpu.memory_space<vmem>>, vector<1x8x1xf32>
    %58 = vector.shape_cast %57 : vector<1x8x1xf32> to vector<8x1xf32>
    %59 = vector.broadcast %58 : vector<8x1xf32> to vector<8x256xf32>
    %60 = arith.mulf %59, %56 : vector<8x256xf32>
    %61 = arith.addf %53, %60 : vector<8x256xf32>
    %c241_i32 = arith.constant 241 : i32
    %62 = tpu.dynamic_rotate %0 by %c241_i32 dim 1 : vector<8x256xf32>, i32 -> vector<8x256xf32>
    %63 = vector.broadcast %12 : vector<1x256xf32> to vector<8x256xf32>
    %64 = arith.mulf %62, %63 : vector<8x256xf32>
    %c6_36 = arith.constant 6 : index
    %c0_37 = arith.constant 0 : index
    %c0_38 = arith.constant 0 : index
    %65 = vector.load %arg2[%c6_36, %c0_37, %c0_38] : memref<9x8x1xf32, #tpu.memory_space<vmem>>, vector<1x8x1xf32>
    %66 = vector.shape_cast %65 : vector<1x8x1xf32> to vector<8x1xf32>
    %67 = vector.broadcast %66 : vector<8x1xf32> to vector<8x256xf32>
    %68 = arith.mulf %67, %64 : vector<8x256xf32>
    %69 = arith.addf %61, %68 : vector<8x256xf32>
    %c240_i32 = arith.constant 240 : i32
    %70 = tpu.dynamic_rotate %0 by %c240_i32 dim 1 : vector<8x256xf32>, i32 -> vector<8x256xf32>
    %71 = vector.broadcast %14 : vector<1x256xf32> to vector<8x256xf32>
    %72 = arith.mulf %70, %71 : vector<8x256xf32>
    %c7_39 = arith.constant 7 : index
    %c0_40 = arith.constant 0 : index
    %c0_41 = arith.constant 0 : index
    %73 = vector.load %arg2[%c7_39, %c0_40, %c0_41] : memref<9x8x1xf32, #tpu.memory_space<vmem>>, vector<1x8x1xf32>
    %74 = vector.shape_cast %73 : vector<1x8x1xf32> to vector<8x1xf32>
    %75 = vector.broadcast %74 : vector<8x1xf32> to vector<8x256xf32>
    %76 = arith.mulf %75, %72 : vector<8x256xf32>
    %77 = arith.addf %69, %76 : vector<8x256xf32>
    %c239_i32 = arith.constant 239 : i32
    %78 = tpu.dynamic_rotate %0 by %c239_i32 dim 1 : vector<8x256xf32>, i32 -> vector<8x256xf32>
    %79 = vector.broadcast %16 : vector<1x256xf32> to vector<8x256xf32>
    %80 = arith.mulf %78, %79 : vector<8x256xf32>
    %c8_42 = arith.constant 8 : index
    %c0_43 = arith.constant 0 : index
    %c0_44 = arith.constant 0 : index
    %81 = vector.load %arg2[%c8_42, %c0_43, %c0_44] : memref<9x8x1xf32, #tpu.memory_space<vmem>>, vector<1x8x1xf32>
    %82 = vector.shape_cast %81 : vector<1x8x1xf32> to vector<8x1xf32>
    %83 = vector.broadcast %82 : vector<8x1xf32> to vector<8x256xf32>
    %84 = arith.mulf %83, %80 : vector<8x256xf32>
    %85 = arith.addf %77, %84 : vector<8x256xf32>
    %c0_45 = arith.constant 0 : index
    %86 = memref.load %arg6[%c0_45] : memref<4xf32, #tpu.memory_space<smem>>
    %c0_46 = arith.constant 0 : index
    %c0_47 = arith.constant 0 : index
    %87 = memref.load %arg5[%c0_46, %c0_47] : memref<4x4xf32, #tpu.memory_space<smem>>
    %88 = vector.extract_strided_slice %85 {offsets = [0, 0], sizes = [1, 256], strides = [1, 1]} : vector<8x256xf32> to vector<1x256xf32>
    %89 = vector.broadcast %87 : f32 to vector<1x256xf32>
    %90 = arith.mulf %89, %88 : vector<1x256xf32>
    %91 = vector.broadcast %86 : f32 to vector<1x256xf32>
    %92 = arith.addf %91, %90 : vector<1x256xf32>
    %c0_48 = arith.constant 0 : index
    %c1_49 = arith.constant 1 : index
    %93 = memref.load %arg5[%c0_48, %c1_49] : memref<4x4xf32, #tpu.memory_space<smem>>
    %94 = vector.extract_strided_slice %85 {offsets = [1, 0], sizes = [1, 256], strides = [1, 1]} : vector<8x256xf32> to vector<1x256xf32>
    %95 = vector.broadcast %93 : f32 to vector<1x256xf32>
    %96 = arith.mulf %95, %94 : vector<1x256xf32>
    %97 = arith.addf %92, %96 : vector<1x256xf32>
    %c0_50 = arith.constant 0 : index
    %c2_51 = arith.constant 2 : index
    %98 = memref.load %arg5[%c0_50, %c2_51] : memref<4x4xf32, #tpu.memory_space<smem>>
    %99 = vector.extract_strided_slice %85 {offsets = [2, 0], sizes = [1, 256], strides = [1, 1]} : vector<8x256xf32> to vector<1x256xf32>
    %100 = vector.broadcast %98 : f32 to vector<1x256xf32>
    %101 = arith.mulf %100, %99 : vector<1x256xf32>
    %102 = arith.addf %97, %101 : vector<1x256xf32>
    %c0_52 = arith.constant 0 : index
    %c3_53 = arith.constant 3 : index
    %103 = memref.load %arg5[%c0_52, %c3_53] : memref<4x4xf32, #tpu.memory_space<smem>>
    %104 = vector.extract_strided_slice %85 {offsets = [3, 0], sizes = [1, 256], strides = [1, 1]} : vector<8x256xf32> to vector<1x256xf32>
    %105 = vector.broadcast %103 : f32 to vector<1x256xf32>
    %106 = arith.mulf %105, %104 : vector<1x256xf32>
    %107 = arith.addf %102, %106 : vector<1x256xf32>
    %c1_54 = arith.constant 1 : index
    %108 = memref.load %arg6[%c1_54] : memref<4xf32, #tpu.memory_space<smem>>
    %c1_55 = arith.constant 1 : index
    %c0_56 = arith.constant 0 : index
    %109 = memref.load %arg5[%c1_55, %c0_56] : memref<4x4xf32, #tpu.memory_space<smem>>
    %110 = vector.extract_strided_slice %85 {offsets = [0, 0], sizes = [1, 256], strides = [1, 1]} : vector<8x256xf32> to vector<1x256xf32>
    %111 = vector.broadcast %109 : f32 to vector<1x256xf32>
    %112 = arith.mulf %111, %110 : vector<1x256xf32>
    %113 = vector.broadcast %108 : f32 to vector<1x256xf32>
    %114 = arith.addf %113, %112 : vector<1x256xf32>
    %c1_57 = arith.constant 1 : index
    %c1_58 = arith.constant 1 : index
    %115 = memref.load %arg5[%c1_57, %c1_58] : memref<4x4xf32, #tpu.memory_space<smem>>
    %116 = vector.extract_strided_slice %85 {offsets = [1, 0], sizes = [1, 256], strides = [1, 1]} : vector<8x256xf32> to vector<1x256xf32>
    %117 = vector.broadcast %115 : f32 to vector<1x256xf32>
    %118 = arith.mulf %117, %116 : vector<1x256xf32>
    %119 = arith.addf %114, %118 : vector<1x256xf32>
    %c1_59 = arith.constant 1 : index
    %c2_60 = arith.constant 2 : index
    %120 = memref.load %arg5[%c1_59, %c2_60] : memref<4x4xf32, #tpu.memory_space<smem>>
    %121 = vector.extract_strided_slice %85 {offsets = [2, 0], sizes = [1, 256], strides = [1, 1]} : vector<8x256xf32> to vector<1x256xf32>
    %122 = vector.broadcast %120 : f32 to vector<1x256xf32>
    %123 = arith.mulf %122, %121 : vector<1x256xf32>
    %124 = arith.addf %119, %123 : vector<1x256xf32>
    %c1_61 = arith.constant 1 : index
    %c3_62 = arith.constant 3 : index
    %125 = memref.load %arg5[%c1_61, %c3_62] : memref<4x4xf32, #tpu.memory_space<smem>>
    %126 = vector.extract_strided_slice %85 {offsets = [3, 0], sizes = [1, 256], strides = [1, 1]} : vector<8x256xf32> to vector<1x256xf32>
    %127 = vector.broadcast %125 : f32 to vector<1x256xf32>
    %128 = arith.mulf %127, %126 : vector<1x256xf32>
    %129 = arith.addf %124, %128 : vector<1x256xf32>
    %c2_63 = arith.constant 2 : index
    %130 = memref.load %arg6[%c2_63] : memref<4xf32, #tpu.memory_space<smem>>
    %c2_64 = arith.constant 2 : index
    %c0_65 = arith.constant 0 : index
    %131 = memref.load %arg5[%c2_64, %c0_65] : memref<4x4xf32, #tpu.memory_space<smem>>
    %132 = vector.extract_strided_slice %85 {offsets = [0, 0], sizes = [1, 256], strides = [1, 1]} : vector<8x256xf32> to vector<1x256xf32>
    %133 = vector.broadcast %131 : f32 to vector<1x256xf32>
    %134 = arith.mulf %133, %132 : vector<1x256xf32>
    %135 = vector.broadcast %130 : f32 to vector<1x256xf32>
    %136 = arith.addf %135, %134 : vector<1x256xf32>
    %c2_66 = arith.constant 2 : index
    %c1_67 = arith.constant 1 : index
    %137 = memref.load %arg5[%c2_66, %c1_67] : memref<4x4xf32, #tpu.memory_space<smem>>
    %138 = vector.extract_strided_slice %85 {offsets = [1, 0], sizes = [1, 256], strides = [1, 1]} : vector<8x256xf32> to vector<1x256xf32>
    %139 = vector.broadcast %137 : f32 to vector<1x256xf32>
    %140 = arith.mulf %139, %138 : vector<1x256xf32>
    %141 = arith.addf %136, %140 : vector<1x256xf32>
    %c2_68 = arith.constant 2 : index
    %c2_69 = arith.constant 2 : index
    %142 = memref.load %arg5[%c2_68, %c2_69] : memref<4x4xf32, #tpu.memory_space<smem>>
    %143 = vector.extract_strided_slice %85 {offsets = [2, 0], sizes = [1, 256], strides = [1, 1]} : vector<8x256xf32> to vector<1x256xf32>
    %144 = vector.broadcast %142 : f32 to vector<1x256xf32>
    %145 = arith.mulf %144, %143 : vector<1x256xf32>
    %146 = arith.addf %141, %145 : vector<1x256xf32>
    %c2_70 = arith.constant 2 : index
    %c3_71 = arith.constant 3 : index
    %147 = memref.load %arg5[%c2_70, %c3_71] : memref<4x4xf32, #tpu.memory_space<smem>>
    %148 = vector.extract_strided_slice %85 {offsets = [3, 0], sizes = [1, 256], strides = [1, 1]} : vector<8x256xf32> to vector<1x256xf32>
    %149 = vector.broadcast %147 : f32 to vector<1x256xf32>
    %150 = arith.mulf %149, %148 : vector<1x256xf32>
    %151 = arith.addf %146, %150 : vector<1x256xf32>
    %c3_72 = arith.constant 3 : index
    %152 = memref.load %arg6[%c3_72] : memref<4xf32, #tpu.memory_space<smem>>
    %c3_73 = arith.constant 3 : index
    %c0_74 = arith.constant 0 : index
    %153 = memref.load %arg5[%c3_73, %c0_74] : memref<4x4xf32, #tpu.memory_space<smem>>
    %154 = vector.extract_strided_slice %85 {offsets = [0, 0], sizes = [1, 256], strides = [1, 1]} : vector<8x256xf32> to vector<1x256xf32>
    %155 = vector.broadcast %153 : f32 to vector<1x256xf32>
    %156 = arith.mulf %155, %154 : vector<1x256xf32>
    %157 = vector.broadcast %152 : f32 to vector<1x256xf32>
    %158 = arith.addf %157, %156 : vector<1x256xf32>
    %c3_75 = arith.constant 3 : index
    %c1_76 = arith.constant 1 : index
    %159 = memref.load %arg5[%c3_75, %c1_76] : memref<4x4xf32, #tpu.memory_space<smem>>
    %160 = vector.extract_strided_slice %85 {offsets = [1, 0], sizes = [1, 256], strides = [1, 1]} : vector<8x256xf32> to vector<1x256xf32>
    %161 = vector.broadcast %159 : f32 to vector<1x256xf32>
    %162 = arith.mulf %161, %160 : vector<1x256xf32>
    %163 = arith.addf %158, %162 : vector<1x256xf32>
    %c3_77 = arith.constant 3 : index
    %c2_78 = arith.constant 2 : index
    %164 = memref.load %arg5[%c3_77, %c2_78] : memref<4x4xf32, #tpu.memory_space<smem>>
    %165 = vector.extract_strided_slice %85 {offsets = [2, 0], sizes = [1, 256], strides = [1, 1]} : vector<8x256xf32> to vector<1x256xf32>
    %166 = vector.broadcast %164 : f32 to vector<1x256xf32>
    %167 = arith.mulf %166, %165 : vector<1x256xf32>
    %168 = arith.addf %163, %167 : vector<1x256xf32>
    %c3_79 = arith.constant 3 : index
    %c3_80 = arith.constant 3 : index
    %169 = memref.load %arg5[%c3_79, %c3_80] : memref<4x4xf32, #tpu.memory_space<smem>>
    %170 = vector.extract_strided_slice %85 {offsets = [3, 0], sizes = [1, 256], strides = [1, 1]} : vector<8x256xf32> to vector<1x256xf32>
    %171 = vector.broadcast %169 : f32 to vector<1x256xf32>
    %172 = arith.mulf %171, %170 : vector<1x256xf32>
    %173 = arith.addf %168, %172 : vector<1x256xf32>
    %c0_81 = arith.constant 0 : index
    %174 = memref.load %arg6[%c0_81] : memref<4xf32, #tpu.memory_space<smem>>
    %c0_82 = arith.constant 0 : index
    %c0_83 = arith.constant 0 : index
    %175 = memref.load %arg5[%c0_82, %c0_83] : memref<4x4xf32, #tpu.memory_space<smem>>
    %176 = vector.extract_strided_slice %85 {offsets = [4, 0], sizes = [1, 256], strides = [1, 1]} : vector<8x256xf32> to vector<1x256xf32>
    %177 = vector.broadcast %175 : f32 to vector<1x256xf32>
    %178 = arith.mulf %177, %176 : vector<1x256xf32>
    %179 = vector.broadcast %174 : f32 to vector<1x256xf32>
    %180 = arith.addf %179, %178 : vector<1x256xf32>
    %c0_84 = arith.constant 0 : index
    %c1_85 = arith.constant 1 : index
    %181 = memref.load %arg5[%c0_84, %c1_85] : memref<4x4xf32, #tpu.memory_space<smem>>
    %182 = vector.extract_strided_slice %85 {offsets = [5, 0], sizes = [1, 256], strides = [1, 1]} : vector<8x256xf32> to vector<1x256xf32>
    %183 = vector.broadcast %181 : f32 to vector<1x256xf32>
    %184 = arith.mulf %183, %182 : vector<1x256xf32>
    %185 = arith.addf %180, %184 : vector<1x256xf32>
    %c0_86 = arith.constant 0 : index
    %c2_87 = arith.constant 2 : index
    %186 = memref.load %arg5[%c0_86, %c2_87] : memref<4x4xf32, #tpu.memory_space<smem>>
    %187 = vector.extract_strided_slice %85 {offsets = [6, 0], sizes = [1, 256], strides = [1, 1]} : vector<8x256xf32> to vector<1x256xf32>
    %188 = vector.broadcast %186 : f32 to vector<1x256xf32>
    %189 = arith.mulf %188, %187 : vector<1x256xf32>
    %190 = arith.addf %185, %189 : vector<1x256xf32>
    %c0_88 = arith.constant 0 : index
    %c3_89 = arith.constant 3 : index
    %191 = memref.load %arg5[%c0_88, %c3_89] : memref<4x4xf32, #tpu.memory_space<smem>>
    %192 = vector.extract_strided_slice %85 {offsets = [7, 0], sizes = [1, 256], strides = [1, 1]} : vector<8x256xf32> to vector<1x256xf32>
    %193 = vector.broadcast %191 : f32 to vector<1x256xf32>
    %194 = arith.mulf %193, %192 : vector<1x256xf32>
    %195 = arith.addf %190, %194 : vector<1x256xf32>
    %c1_90 = arith.constant 1 : index
    %196 = memref.load %arg6[%c1_90] : memref<4xf32, #tpu.memory_space<smem>>
    %c1_91 = arith.constant 1 : index
    %c0_92 = arith.constant 0 : index
    %197 = memref.load %arg5[%c1_91, %c0_92] : memref<4x4xf32, #tpu.memory_space<smem>>
    %198 = vector.extract_strided_slice %85 {offsets = [4, 0], sizes = [1, 256], strides = [1, 1]} : vector<8x256xf32> to vector<1x256xf32>
    %199 = vector.broadcast %197 : f32 to vector<1x256xf32>
    %200 = arith.mulf %199, %198 : vector<1x256xf32>
    %201 = vector.broadcast %196 : f32 to vector<1x256xf32>
    %202 = arith.addf %201, %200 : vector<1x256xf32>
    %c1_93 = arith.constant 1 : index
    %c1_94 = arith.constant 1 : index
    %203 = memref.load %arg5[%c1_93, %c1_94] : memref<4x4xf32, #tpu.memory_space<smem>>
    %204 = vector.extract_strided_slice %85 {offsets = [5, 0], sizes = [1, 256], strides = [1, 1]} : vector<8x256xf32> to vector<1x256xf32>
    %205 = vector.broadcast %203 : f32 to vector<1x256xf32>
    %206 = arith.mulf %205, %204 : vector<1x256xf32>
    %207 = arith.addf %202, %206 : vector<1x256xf32>
    %c1_95 = arith.constant 1 : index
    %c2_96 = arith.constant 2 : index
    %208 = memref.load %arg5[%c1_95, %c2_96] : memref<4x4xf32, #tpu.memory_space<smem>>
    %209 = vector.extract_strided_slice %85 {offsets = [6, 0], sizes = [1, 256], strides = [1, 1]} : vector<8x256xf32> to vector<1x256xf32>
    %210 = vector.broadcast %208 : f32 to vector<1x256xf32>
    %211 = arith.mulf %210, %209 : vector<1x256xf32>
    %212 = arith.addf %207, %211 : vector<1x256xf32>
    %c1_97 = arith.constant 1 : index
    %c3_98 = arith.constant 3 : index
    %213 = memref.load %arg5[%c1_97, %c3_98] : memref<4x4xf32, #tpu.memory_space<smem>>
    %214 = vector.extract_strided_slice %85 {offsets = [7, 0], sizes = [1, 256], strides = [1, 1]} : vector<8x256xf32> to vector<1x256xf32>
    %215 = vector.broadcast %213 : f32 to vector<1x256xf32>
    %216 = arith.mulf %215, %214 : vector<1x256xf32>
    %217 = arith.addf %212, %216 : vector<1x256xf32>
    %c2_99 = arith.constant 2 : index
    %218 = memref.load %arg6[%c2_99] : memref<4xf32, #tpu.memory_space<smem>>
    %c2_100 = arith.constant 2 : index
    %c0_101 = arith.constant 0 : index
    %219 = memref.load %arg5[%c2_100, %c0_101] : memref<4x4xf32, #tpu.memory_space<smem>>
    %220 = vector.extract_strided_slice %85 {offsets = [4, 0], sizes = [1, 256], strides = [1, 1]} : vector<8x256xf32> to vector<1x256xf32>
    %221 = vector.broadcast %219 : f32 to vector<1x256xf32>
    %222 = arith.mulf %221, %220 : vector<1x256xf32>
    %223 = vector.broadcast %218 : f32 to vector<1x256xf32>
    %224 = arith.addf %223, %222 : vector<1x256xf32>
    %c2_102 = arith.constant 2 : index
    %c1_103 = arith.constant 1 : index
    %225 = memref.load %arg5[%c2_102, %c1_103] : memref<4x4xf32, #tpu.memory_space<smem>>
    %226 = vector.extract_strided_slice %85 {offsets = [5, 0], sizes = [1, 256], strides = [1, 1]} : vector<8x256xf32> to vector<1x256xf32>
    %227 = vector.broadcast %225 : f32 to vector<1x256xf32>
    %228 = arith.mulf %227, %226 : vector<1x256xf32>
    %229 = arith.addf %224, %228 : vector<1x256xf32>
    %c2_104 = arith.constant 2 : index
    %c2_105 = arith.constant 2 : index
    %230 = memref.load %arg5[%c2_104, %c2_105] : memref<4x4xf32, #tpu.memory_space<smem>>
    %231 = vector.extract_strided_slice %85 {offsets = [6, 0], sizes = [1, 256], strides = [1, 1]} : vector<8x256xf32> to vector<1x256xf32>
    %232 = vector.broadcast %230 : f32 to vector<1x256xf32>
    %233 = arith.mulf %232, %231 : vector<1x256xf32>
    %234 = arith.addf %229, %233 : vector<1x256xf32>
    %c2_106 = arith.constant 2 : index
    %c3_107 = arith.constant 3 : index
    %235 = memref.load %arg5[%c2_106, %c3_107] : memref<4x4xf32, #tpu.memory_space<smem>>
    %236 = vector.extract_strided_slice %85 {offsets = [7, 0], sizes = [1, 256], strides = [1, 1]} : vector<8x256xf32> to vector<1x256xf32>
    %237 = vector.broadcast %235 : f32 to vector<1x256xf32>
    %238 = arith.mulf %237, %236 : vector<1x256xf32>
    %239 = arith.addf %234, %238 : vector<1x256xf32>
    %c3_108 = arith.constant 3 : index
    %240 = memref.load %arg6[%c3_108] : memref<4xf32, #tpu.memory_space<smem>>
    %c3_109 = arith.constant 3 : index
    %c0_110 = arith.constant 0 : index
    %241 = memref.load %arg5[%c3_109, %c0_110] : memref<4x4xf32, #tpu.memory_space<smem>>
    %242 = vector.extract_strided_slice %85 {offsets = [4, 0], sizes = [1, 256], strides = [1, 1]} : vector<8x256xf32> to vector<1x256xf32>
    %243 = vector.broadcast %241 : f32 to vector<1x256xf32>
    %244 = arith.mulf %243, %242 : vector<1x256xf32>
    %245 = vector.broadcast %240 : f32 to vector<1x256xf32>
    %246 = arith.addf %245, %244 : vector<1x256xf32>
    %c3_111 = arith.constant 3 : index
    %c1_112 = arith.constant 1 : index
    %247 = memref.load %arg5[%c3_111, %c1_112] : memref<4x4xf32, #tpu.memory_space<smem>>
    %248 = vector.extract_strided_slice %85 {offsets = [5, 0], sizes = [1, 256], strides = [1, 1]} : vector<8x256xf32> to vector<1x256xf32>
    %249 = vector.broadcast %247 : f32 to vector<1x256xf32>
    %250 = arith.mulf %249, %248 : vector<1x256xf32>
    %251 = arith.addf %246, %250 : vector<1x256xf32>
    %c3_113 = arith.constant 3 : index
    %c2_114 = arith.constant 2 : index
    %252 = memref.load %arg5[%c3_113, %c2_114] : memref<4x4xf32, #tpu.memory_space<smem>>
    %253 = vector.extract_strided_slice %85 {offsets = [6, 0], sizes = [1, 256], strides = [1, 1]} : vector<8x256xf32> to vector<1x256xf32>
    %254 = vector.broadcast %252 : f32 to vector<1x256xf32>
    %255 = arith.mulf %254, %253 : vector<1x256xf32>
    %256 = arith.addf %251, %255 : vector<1x256xf32>
    %c3_115 = arith.constant 3 : index
    %c3_116 = arith.constant 3 : index
    %257 = memref.load %arg5[%c3_115, %c3_116] : memref<4x4xf32, #tpu.memory_space<smem>>
    %258 = vector.extract_strided_slice %85 {offsets = [7, 0], sizes = [1, 256], strides = [1, 1]} : vector<8x256xf32> to vector<1x256xf32>
    %259 = vector.broadcast %257 : f32 to vector<1x256xf32>
    %260 = arith.mulf %259, %258 : vector<1x256xf32>
    %261 = arith.addf %256, %260 : vector<1x256xf32>
    %262 = tpu.concatenate %107, %129, %151, %173, %195, %217, %239, %261 in 0 : vector<1x256xf32>, vector<1x256xf32>, vector<1x256xf32>, vector<1x256xf32>, vector<1x256xf32>, vector<1x256xf32>, vector<1x256xf32>, vector<1x256xf32> -> vector<8x256xf32>
    %cst = arith.constant 0.000000e+00 : f32
    %263 = vector.broadcast %cst : f32 to vector<8x256xf32>
    %264 = arith.cmpf oge, %262, %263 : vector<8x256xf32>
    %265 = vector.broadcast %17 : f32 to vector<8x256xf32>
    %266 = arith.mulf %265, %262 : vector<8x256xf32>
    %267 = arith.select %264, %262, %266 : vector<8x256xi1>, vector<8x256xf32>
    %c17_i32_117 = arith.constant 17 : i32
    %268 = tpu.dynamic_rotate %267 by %c17_i32_117 dim 1 : vector<8x256xf32>, i32 -> vector<8x256xf32>
    %269 = vector.broadcast %2 : vector<1x256xf32> to vector<8x256xf32>
    %270 = arith.mulf %268, %269 : vector<8x256xf32>
    %c0_118 = arith.constant 0 : index
    %c0_119 = arith.constant 0 : index
    %c0_120 = arith.constant 0 : index
    %271 = vector.load %arg3[%c0_118, %c0_119, %c0_120] : memref<9x8x1xf32, #tpu.memory_space<vmem>>, vector<1x8x1xf32>
    %272 = vector.shape_cast %271 : vector<1x8x1xf32> to vector<8x1xf32>
    %273 = vector.broadcast %272 : vector<8x1xf32> to vector<8x256xf32>
    %274 = arith.mulf %273, %270 : vector<8x256xf32>
    %c16_i32_121 = arith.constant 16 : i32
    %275 = tpu.dynamic_rotate %267 by %c16_i32_121 dim 1 : vector<8x256xf32>, i32 -> vector<8x256xf32>
    %276 = vector.broadcast %4 : vector<1x256xf32> to vector<8x256xf32>
    %277 = arith.mulf %275, %276 : vector<8x256xf32>
    %c1_122 = arith.constant 1 : index
    %c0_123 = arith.constant 0 : index
    %c0_124 = arith.constant 0 : index
    %278 = vector.load %arg3[%c1_122, %c0_123, %c0_124] : memref<9x8x1xf32, #tpu.memory_space<vmem>>, vector<1x8x1xf32>
    %279 = vector.shape_cast %278 : vector<1x8x1xf32> to vector<8x1xf32>
    %280 = vector.broadcast %279 : vector<8x1xf32> to vector<8x256xf32>
    %281 = arith.mulf %280, %277 : vector<8x256xf32>
    %282 = arith.addf %274, %281 : vector<8x256xf32>
    %c15_i32_125 = arith.constant 15 : i32
    %283 = tpu.dynamic_rotate %267 by %c15_i32_125 dim 1 : vector<8x256xf32>, i32 -> vector<8x256xf32>
    %284 = vector.broadcast %6 : vector<1x256xf32> to vector<8x256xf32>
    %285 = arith.mulf %283, %284 : vector<8x256xf32>
    %c2_126 = arith.constant 2 : index
    %c0_127 = arith.constant 0 : index
    %c0_128 = arith.constant 0 : index
    %286 = vector.load %arg3[%c2_126, %c0_127, %c0_128] : memref<9x8x1xf32, #tpu.memory_space<vmem>>, vector<1x8x1xf32>
    %287 = vector.shape_cast %286 : vector<1x8x1xf32> to vector<8x1xf32>
    %288 = vector.broadcast %287 : vector<8x1xf32> to vector<8x256xf32>
    %289 = arith.mulf %288, %285 : vector<8x256xf32>
    %290 = arith.addf %282, %289 : vector<8x256xf32>
    %c1_i32_129 = arith.constant 1 : i32
    %291 = tpu.dynamic_rotate %267 by %c1_i32_129 dim 1 : vector<8x256xf32>, i32 -> vector<8x256xf32>
    %292 = vector.broadcast %8 : vector<1x256xf32> to vector<8x256xf32>
    %293 = arith.mulf %291, %292 : vector<8x256xf32>
    %c3_130 = arith.constant 3 : index
    %c0_131 = arith.constant 0 : index
    %c0_132 = arith.constant 0 : index
    %294 = vector.load %arg3[%c3_130, %c0_131, %c0_132] : memref<9x8x1xf32, #tpu.memory_space<vmem>>, vector<1x8x1xf32>
    %295 = vector.shape_cast %294 : vector<1x8x1xf32> to vector<8x1xf32>
    %296 = vector.broadcast %295 : vector<8x1xf32> to vector<8x256xf32>
    %297 = arith.mulf %296, %293 : vector<8x256xf32>
    %298 = arith.addf %290, %297 : vector<8x256xf32>
    %c4_133 = arith.constant 4 : index
    %c0_134 = arith.constant 0 : index
    %c0_135 = arith.constant 0 : index
    %299 = vector.load %arg3[%c4_133, %c0_134, %c0_135] : memref<9x8x1xf32, #tpu.memory_space<vmem>>, vector<1x8x1xf32>
    %300 = vector.shape_cast %299 : vector<1x8x1xf32> to vector<8x1xf32>
    %301 = vector.broadcast %300 : vector<8x1xf32> to vector<8x256xf32>
    %302 = arith.mulf %301, %267 : vector<8x256xf32>
    %303 = arith.addf %298, %302 : vector<8x256xf32>
    %c255_i32_136 = arith.constant 255 : i32
    %304 = tpu.dynamic_rotate %267 by %c255_i32_136 dim 1 : vector<8x256xf32>, i32 -> vector<8x256xf32>
    %305 = vector.broadcast %10 : vector<1x256xf32> to vector<8x256xf32>
    %306 = arith.mulf %304, %305 : vector<8x256xf32>
    %c5_137 = arith.constant 5 : index
    %c0_138 = arith.constant 0 : index
    %c0_139 = arith.constant 0 : index
    %307 = vector.load %arg3[%c5_137, %c0_138, %c0_139] : memref<9x8x1xf32, #tpu.memory_space<vmem>>, vector<1x8x1xf32>
    %308 = vector.shape_cast %307 : vector<1x8x1xf32> to vector<8x1xf32>
    %309 = vector.broadcast %308 : vector<8x1xf32> to vector<8x256xf32>
    %310 = arith.mulf %309, %306 : vector<8x256xf32>
    %311 = arith.addf %303, %310 : vector<8x256xf32>
    %c241_i32_140 = arith.constant 241 : i32
    %312 = tpu.dynamic_rotate %267 by %c241_i32_140 dim 1 : vector<8x256xf32>, i32 -> vector<8x256xf32>
    %313 = vector.broadcast %12 : vector<1x256xf32> to vector<8x256xf32>
    %314 = arith.mulf %312, %313 : vector<8x256xf32>
    %c6_141 = arith.constant 6 : index
    %c0_142 = arith.constant 0 : index
    %c0_143 = arith.constant 0 : index
    %315 = vector.load %arg3[%c6_141, %c0_142, %c0_143] : memref<9x8x1xf32, #tpu.memory_space<vmem>>, vector<1x8x1xf32>
    %316 = vector.shape_cast %315 : vector<1x8x1xf32> to vector<8x1xf32>
    %317 = vector.broadcast %316 : vector<8x1xf32> to vector<8x256xf32>
    %318 = arith.mulf %317, %314 : vector<8x256xf32>
    %319 = arith.addf %311, %318 : vector<8x256xf32>
    %c240_i32_144 = arith.constant 240 : i32
    %320 = tpu.dynamic_rotate %267 by %c240_i32_144 dim 1 : vector<8x256xf32>, i32 -> vector<8x256xf32>
    %321 = vector.broadcast %14 : vector<1x256xf32> to vector<8x256xf32>
    %322 = arith.mulf %320, %321 : vector<8x256xf32>
    %c7_145 = arith.constant 7 : index
    %c0_146 = arith.constant 0 : index
    %c0_147 = arith.constant 0 : index
    %323 = vector.load %arg3[%c7_145, %c0_146, %c0_147] : memref<9x8x1xf32, #tpu.memory_space<vmem>>, vector<1x8x1xf32>
    %324 = vector.shape_cast %323 : vector<1x8x1xf32> to vector<8x1xf32>
    %325 = vector.broadcast %324 : vector<8x1xf32> to vector<8x256xf32>
    %326 = arith.mulf %325, %322 : vector<8x256xf32>
    %327 = arith.addf %319, %326 : vector<8x256xf32>
    %c239_i32_148 = arith.constant 239 : i32
    %328 = tpu.dynamic_rotate %267 by %c239_i32_148 dim 1 : vector<8x256xf32>, i32 -> vector<8x256xf32>
    %329 = vector.broadcast %16 : vector<1x256xf32> to vector<8x256xf32>
    %330 = arith.mulf %328, %329 : vector<8x256xf32>
    %c8_149 = arith.constant 8 : index
    %c0_150 = arith.constant 0 : index
    %c0_151 = arith.constant 0 : index
    %331 = vector.load %arg3[%c8_149, %c0_150, %c0_151] : memref<9x8x1xf32, #tpu.memory_space<vmem>>, vector<1x8x1xf32>
    %332 = vector.shape_cast %331 : vector<1x8x1xf32> to vector<8x1xf32>
    %333 = vector.broadcast %332 : vector<8x1xf32> to vector<8x256xf32>
    %334 = arith.mulf %333, %330 : vector<8x256xf32>
    %335 = arith.addf %327, %334 : vector<8x256xf32>
    %c0_152 = arith.constant 0 : index
    %336 = memref.load %arg9[%c0_152] : memref<4xf32, #tpu.memory_space<smem>>
    %c0_153 = arith.constant 0 : index
    %c0_154 = arith.constant 0 : index
    %337 = memref.load %arg8[%c0_153, %c0_154] : memref<4x4xf32, #tpu.memory_space<smem>>
    %338 = vector.extract_strided_slice %335 {offsets = [0, 0], sizes = [1, 256], strides = [1, 1]} : vector<8x256xf32> to vector<1x256xf32>
    %339 = vector.broadcast %337 : f32 to vector<1x256xf32>
    %340 = arith.mulf %339, %338 : vector<1x256xf32>
    %341 = vector.broadcast %336 : f32 to vector<1x256xf32>
    %342 = arith.addf %341, %340 : vector<1x256xf32>
    %c0_155 = arith.constant 0 : index
    %c1_156 = arith.constant 1 : index
    %343 = memref.load %arg8[%c0_155, %c1_156] : memref<4x4xf32, #tpu.memory_space<smem>>
    %344 = vector.extract_strided_slice %335 {offsets = [1, 0], sizes = [1, 256], strides = [1, 1]} : vector<8x256xf32> to vector<1x256xf32>
    %345 = vector.broadcast %343 : f32 to vector<1x256xf32>
    %346 = arith.mulf %345, %344 : vector<1x256xf32>
    %347 = arith.addf %342, %346 : vector<1x256xf32>
    %c0_157 = arith.constant 0 : index
    %c2_158 = arith.constant 2 : index
    %348 = memref.load %arg8[%c0_157, %c2_158] : memref<4x4xf32, #tpu.memory_space<smem>>
    %349 = vector.extract_strided_slice %335 {offsets = [2, 0], sizes = [1, 256], strides = [1, 1]} : vector<8x256xf32> to vector<1x256xf32>
    %350 = vector.broadcast %348 : f32 to vector<1x256xf32>
    %351 = arith.mulf %350, %349 : vector<1x256xf32>
    %352 = arith.addf %347, %351 : vector<1x256xf32>
    %c0_159 = arith.constant 0 : index
    %c3_160 = arith.constant 3 : index
    %353 = memref.load %arg8[%c0_159, %c3_160] : memref<4x4xf32, #tpu.memory_space<smem>>
    %354 = vector.extract_strided_slice %335 {offsets = [3, 0], sizes = [1, 256], strides = [1, 1]} : vector<8x256xf32> to vector<1x256xf32>
    %355 = vector.broadcast %353 : f32 to vector<1x256xf32>
    %356 = arith.mulf %355, %354 : vector<1x256xf32>
    %357 = arith.addf %352, %356 : vector<1x256xf32>
    %c1_161 = arith.constant 1 : index
    %358 = memref.load %arg9[%c1_161] : memref<4xf32, #tpu.memory_space<smem>>
    %c1_162 = arith.constant 1 : index
    %c0_163 = arith.constant 0 : index
    %359 = memref.load %arg8[%c1_162, %c0_163] : memref<4x4xf32, #tpu.memory_space<smem>>
    %360 = vector.extract_strided_slice %335 {offsets = [0, 0], sizes = [1, 256], strides = [1, 1]} : vector<8x256xf32> to vector<1x256xf32>
    %361 = vector.broadcast %359 : f32 to vector<1x256xf32>
    %362 = arith.mulf %361, %360 : vector<1x256xf32>
    %363 = vector.broadcast %358 : f32 to vector<1x256xf32>
    %364 = arith.addf %363, %362 : vector<1x256xf32>
    %c1_164 = arith.constant 1 : index
    %c1_165 = arith.constant 1 : index
    %365 = memref.load %arg8[%c1_164, %c1_165] : memref<4x4xf32, #tpu.memory_space<smem>>
    %366 = vector.extract_strided_slice %335 {offsets = [1, 0], sizes = [1, 256], strides = [1, 1]} : vector<8x256xf32> to vector<1x256xf32>
    %367 = vector.broadcast %365 : f32 to vector<1x256xf32>
    %368 = arith.mulf %367, %366 : vector<1x256xf32>
    %369 = arith.addf %364, %368 : vector<1x256xf32>
    %c1_166 = arith.constant 1 : index
    %c2_167 = arith.constant 2 : index
    %370 = memref.load %arg8[%c1_166, %c2_167] : memref<4x4xf32, #tpu.memory_space<smem>>
    %371 = vector.extract_strided_slice %335 {offsets = [2, 0], sizes = [1, 256], strides = [1, 1]} : vector<8x256xf32> to vector<1x256xf32>
    %372 = vector.broadcast %370 : f32 to vector<1x256xf32>
    %373 = arith.mulf %372, %371 : vector<1x256xf32>
    %374 = arith.addf %369, %373 : vector<1x256xf32>
    %c1_168 = arith.constant 1 : index
    %c3_169 = arith.constant 3 : index
    %375 = memref.load %arg8[%c1_168, %c3_169] : memref<4x4xf32, #tpu.memory_space<smem>>
    %376 = vector.extract_strided_slice %335 {offsets = [3, 0], sizes = [1, 256], strides = [1, 1]} : vector<8x256xf32> to vector<1x256xf32>
    %377 = vector.broadcast %375 : f32 to vector<1x256xf32>
    %378 = arith.mulf %377, %376 : vector<1x256xf32>
    %379 = arith.addf %374, %378 : vector<1x256xf32>
    %c2_170 = arith.constant 2 : index
    %380 = memref.load %arg9[%c2_170] : memref<4xf32, #tpu.memory_space<smem>>
    %c2_171 = arith.constant 2 : index
    %c0_172 = arith.constant 0 : index
    %381 = memref.load %arg8[%c2_171, %c0_172] : memref<4x4xf32, #tpu.memory_space<smem>>
    %382 = vector.extract_strided_slice %335 {offsets = [0, 0], sizes = [1, 256], strides = [1, 1]} : vector<8x256xf32> to vector<1x256xf32>
    %383 = vector.broadcast %381 : f32 to vector<1x256xf32>
    %384 = arith.mulf %383, %382 : vector<1x256xf32>
    %385 = vector.broadcast %380 : f32 to vector<1x256xf32>
    %386 = arith.addf %385, %384 : vector<1x256xf32>
    %c2_173 = arith.constant 2 : index
    %c1_174 = arith.constant 1 : index
    %387 = memref.load %arg8[%c2_173, %c1_174] : memref<4x4xf32, #tpu.memory_space<smem>>
    %388 = vector.extract_strided_slice %335 {offsets = [1, 0], sizes = [1, 256], strides = [1, 1]} : vector<8x256xf32> to vector<1x256xf32>
    %389 = vector.broadcast %387 : f32 to vector<1x256xf32>
    %390 = arith.mulf %389, %388 : vector<1x256xf32>
    %391 = arith.addf %386, %390 : vector<1x256xf32>
    %c2_175 = arith.constant 2 : index
    %c2_176 = arith.constant 2 : index
    %392 = memref.load %arg8[%c2_175, %c2_176] : memref<4x4xf32, #tpu.memory_space<smem>>
    %393 = vector.extract_strided_slice %335 {offsets = [2, 0], sizes = [1, 256], strides = [1, 1]} : vector<8x256xf32> to vector<1x256xf32>
    %394 = vector.broadcast %392 : f32 to vector<1x256xf32>
    %395 = arith.mulf %394, %393 : vector<1x256xf32>
    %396 = arith.addf %391, %395 : vector<1x256xf32>
    %c2_177 = arith.constant 2 : index
    %c3_178 = arith.constant 3 : index
    %397 = memref.load %arg8[%c2_177, %c3_178] : memref<4x4xf32, #tpu.memory_space<smem>>
    %398 = vector.extract_strided_slice %335 {offsets = [3, 0], sizes = [1, 256], strides = [1, 1]} : vector<8x256xf32> to vector<1x256xf32>
    %399 = vector.broadcast %397 : f32 to vector<1x256xf32>
    %400 = arith.mulf %399, %398 : vector<1x256xf32>
    %401 = arith.addf %396, %400 : vector<1x256xf32>
    %c3_179 = arith.constant 3 : index
    %402 = memref.load %arg9[%c3_179] : memref<4xf32, #tpu.memory_space<smem>>
    %c3_180 = arith.constant 3 : index
    %c0_181 = arith.constant 0 : index
    %403 = memref.load %arg8[%c3_180, %c0_181] : memref<4x4xf32, #tpu.memory_space<smem>>
    %404 = vector.extract_strided_slice %335 {offsets = [0, 0], sizes = [1, 256], strides = [1, 1]} : vector<8x256xf32> to vector<1x256xf32>
    %405 = vector.broadcast %403 : f32 to vector<1x256xf32>
    %406 = arith.mulf %405, %404 : vector<1x256xf32>
    %407 = vector.broadcast %402 : f32 to vector<1x256xf32>
    %408 = arith.addf %407, %406 : vector<1x256xf32>
    %c3_182 = arith.constant 3 : index
    %c1_183 = arith.constant 1 : index
    %409 = memref.load %arg8[%c3_182, %c1_183] : memref<4x4xf32, #tpu.memory_space<smem>>
    %410 = vector.extract_strided_slice %335 {offsets = [1, 0], sizes = [1, 256], strides = [1, 1]} : vector<8x256xf32> to vector<1x256xf32>
    %411 = vector.broadcast %409 : f32 to vector<1x256xf32>
    %412 = arith.mulf %411, %410 : vector<1x256xf32>
    %413 = arith.addf %408, %412 : vector<1x256xf32>
    %c3_184 = arith.constant 3 : index
    %c2_185 = arith.constant 2 : index
    %414 = memref.load %arg8[%c3_184, %c2_185] : memref<4x4xf32, #tpu.memory_space<smem>>
    %415 = vector.extract_strided_slice %335 {offsets = [2, 0], sizes = [1, 256], strides = [1, 1]} : vector<8x256xf32> to vector<1x256xf32>
    %416 = vector.broadcast %414 : f32 to vector<1x256xf32>
    %417 = arith.mulf %416, %415 : vector<1x256xf32>
    %418 = arith.addf %413, %417 : vector<1x256xf32>
    %c3_186 = arith.constant 3 : index
    %c3_187 = arith.constant 3 : index
    %419 = memref.load %arg8[%c3_186, %c3_187] : memref<4x4xf32, #tpu.memory_space<smem>>
    %420 = vector.extract_strided_slice %335 {offsets = [3, 0], sizes = [1, 256], strides = [1, 1]} : vector<8x256xf32> to vector<1x256xf32>
    %421 = vector.broadcast %419 : f32 to vector<1x256xf32>
    %422 = arith.mulf %421, %420 : vector<1x256xf32>
    %423 = arith.addf %418, %422 : vector<1x256xf32>
    %c0_188 = arith.constant 0 : index
    %424 = memref.load %arg9[%c0_188] : memref<4xf32, #tpu.memory_space<smem>>
    %c0_189 = arith.constant 0 : index
    %c0_190 = arith.constant 0 : index
    %425 = memref.load %arg8[%c0_189, %c0_190] : memref<4x4xf32, #tpu.memory_space<smem>>
    %426 = vector.extract_strided_slice %335 {offsets = [4, 0], sizes = [1, 256], strides = [1, 1]} : vector<8x256xf32> to vector<1x256xf32>
    %427 = vector.broadcast %425 : f32 to vector<1x256xf32>
    %428 = arith.mulf %427, %426 : vector<1x256xf32>
    %429 = vector.broadcast %424 : f32 to vector<1x256xf32>
    %430 = arith.addf %429, %428 : vector<1x256xf32>
    %c0_191 = arith.constant 0 : index
    %c1_192 = arith.constant 1 : index
    %431 = memref.load %arg8[%c0_191, %c1_192] : memref<4x4xf32, #tpu.memory_space<smem>>
    %432 = vector.extract_strided_slice %335 {offsets = [5, 0], sizes = [1, 256], strides = [1, 1]} : vector<8x256xf32> to vector<1x256xf32>
    %433 = vector.broadcast %431 : f32 to vector<1x256xf32>
    %434 = arith.mulf %433, %432 : vector<1x256xf32>
    %435 = arith.addf %430, %434 : vector<1x256xf32>
    %c0_193 = arith.constant 0 : index
    %c2_194 = arith.constant 2 : index
    %436 = memref.load %arg8[%c0_193, %c2_194] : memref<4x4xf32, #tpu.memory_space<smem>>
    %437 = vector.extract_strided_slice %335 {offsets = [6, 0], sizes = [1, 256], strides = [1, 1]} : vector<8x256xf32> to vector<1x256xf32>
    %438 = vector.broadcast %436 : f32 to vector<1x256xf32>
    %439 = arith.mulf %438, %437 : vector<1x256xf32>
    %440 = arith.addf %435, %439 : vector<1x256xf32>
    %c0_195 = arith.constant 0 : index
    %c3_196 = arith.constant 3 : index
    %441 = memref.load %arg8[%c0_195, %c3_196] : memref<4x4xf32, #tpu.memory_space<smem>>
    %442 = vector.extract_strided_slice %335 {offsets = [7, 0], sizes = [1, 256], strides = [1, 1]} : vector<8x256xf32> to vector<1x256xf32>
    %443 = vector.broadcast %441 : f32 to vector<1x256xf32>
    %444 = arith.mulf %443, %442 : vector<1x256xf32>
    %445 = arith.addf %440, %444 : vector<1x256xf32>
    %c1_197 = arith.constant 1 : index
    %446 = memref.load %arg9[%c1_197] : memref<4xf32, #tpu.memory_space<smem>>
    %c1_198 = arith.constant 1 : index
    %c0_199 = arith.constant 0 : index
    %447 = memref.load %arg8[%c1_198, %c0_199] : memref<4x4xf32, #tpu.memory_space<smem>>
    %448 = vector.extract_strided_slice %335 {offsets = [4, 0], sizes = [1, 256], strides = [1, 1]} : vector<8x256xf32> to vector<1x256xf32>
    %449 = vector.broadcast %447 : f32 to vector<1x256xf32>
    %450 = arith.mulf %449, %448 : vector<1x256xf32>
    %451 = vector.broadcast %446 : f32 to vector<1x256xf32>
    %452 = arith.addf %451, %450 : vector<1x256xf32>
    %c1_200 = arith.constant 1 : index
    %c1_201 = arith.constant 1 : index
    %453 = memref.load %arg8[%c1_200, %c1_201] : memref<4x4xf32, #tpu.memory_space<smem>>
    %454 = vector.extract_strided_slice %335 {offsets = [5, 0], sizes = [1, 256], strides = [1, 1]} : vector<8x256xf32> to vector<1x256xf32>
    %455 = vector.broadcast %453 : f32 to vector<1x256xf32>
    %456 = arith.mulf %455, %454 : vector<1x256xf32>
    %457 = arith.addf %452, %456 : vector<1x256xf32>
    %c1_202 = arith.constant 1 : index
    %c2_203 = arith.constant 2 : index
    %458 = memref.load %arg8[%c1_202, %c2_203] : memref<4x4xf32, #tpu.memory_space<smem>>
    %459 = vector.extract_strided_slice %335 {offsets = [6, 0], sizes = [1, 256], strides = [1, 1]} : vector<8x256xf32> to vector<1x256xf32>
    %460 = vector.broadcast %458 : f32 to vector<1x256xf32>
    %461 = arith.mulf %460, %459 : vector<1x256xf32>
    %462 = arith.addf %457, %461 : vector<1x256xf32>
    %c1_204 = arith.constant 1 : index
    %c3_205 = arith.constant 3 : index
    %463 = memref.load %arg8[%c1_204, %c3_205] : memref<4x4xf32, #tpu.memory_space<smem>>
    %464 = vector.extract_strided_slice %335 {offsets = [7, 0], sizes = [1, 256], strides = [1, 1]} : vector<8x256xf32> to vector<1x256xf32>
    %465 = vector.broadcast %463 : f32 to vector<1x256xf32>
    %466 = arith.mulf %465, %464 : vector<1x256xf32>
    %467 = arith.addf %462, %466 : vector<1x256xf32>
    %c2_206 = arith.constant 2 : index
    %468 = memref.load %arg9[%c2_206] : memref<4xf32, #tpu.memory_space<smem>>
    %c2_207 = arith.constant 2 : index
    %c0_208 = arith.constant 0 : index
    %469 = memref.load %arg8[%c2_207, %c0_208] : memref<4x4xf32, #tpu.memory_space<smem>>
    %470 = vector.extract_strided_slice %335 {offsets = [4, 0], sizes = [1, 256], strides = [1, 1]} : vector<8x256xf32> to vector<1x256xf32>
    %471 = vector.broadcast %469 : f32 to vector<1x256xf32>
    %472 = arith.mulf %471, %470 : vector<1x256xf32>
    %473 = vector.broadcast %468 : f32 to vector<1x256xf32>
    %474 = arith.addf %473, %472 : vector<1x256xf32>
    %c2_209 = arith.constant 2 : index
    %c1_210 = arith.constant 1 : index
    %475 = memref.load %arg8[%c2_209, %c1_210] : memref<4x4xf32, #tpu.memory_space<smem>>
    %476 = vector.extract_strided_slice %335 {offsets = [5, 0], sizes = [1, 256], strides = [1, 1]} : vector<8x256xf32> to vector<1x256xf32>
    %477 = vector.broadcast %475 : f32 to vector<1x256xf32>
    %478 = arith.mulf %477, %476 : vector<1x256xf32>
    %479 = arith.addf %474, %478 : vector<1x256xf32>
    %c2_211 = arith.constant 2 : index
    %c2_212 = arith.constant 2 : index
    %480 = memref.load %arg8[%c2_211, %c2_212] : memref<4x4xf32, #tpu.memory_space<smem>>
    %481 = vector.extract_strided_slice %335 {offsets = [6, 0], sizes = [1, 256], strides = [1, 1]} : vector<8x256xf32> to vector<1x256xf32>
    %482 = vector.broadcast %480 : f32 to vector<1x256xf32>
    %483 = arith.mulf %482, %481 : vector<1x256xf32>
    %484 = arith.addf %479, %483 : vector<1x256xf32>
    %c2_213 = arith.constant 2 : index
    %c3_214 = arith.constant 3 : index
    %485 = memref.load %arg8[%c2_213, %c3_214] : memref<4x4xf32, #tpu.memory_space<smem>>
    %486 = vector.extract_strided_slice %335 {offsets = [7, 0], sizes = [1, 256], strides = [1, 1]} : vector<8x256xf32> to vector<1x256xf32>
    %487 = vector.broadcast %485 : f32 to vector<1x256xf32>
    %488 = arith.mulf %487, %486 : vector<1x256xf32>
    %489 = arith.addf %484, %488 : vector<1x256xf32>
    %c3_215 = arith.constant 3 : index
    %490 = memref.load %arg9[%c3_215] : memref<4xf32, #tpu.memory_space<smem>>
    %c3_216 = arith.constant 3 : index
    %c0_217 = arith.constant 0 : index
    %491 = memref.load %arg8[%c3_216, %c0_217] : memref<4x4xf32, #tpu.memory_space<smem>>
    %492 = vector.extract_strided_slice %335 {offsets = [4, 0], sizes = [1, 256], strides = [1, 1]} : vector<8x256xf32> to vector<1x256xf32>
    %493 = vector.broadcast %491 : f32 to vector<1x256xf32>
    %494 = arith.mulf %493, %492 : vector<1x256xf32>
    %495 = vector.broadcast %490 : f32 to vector<1x256xf32>
    %496 = arith.addf %495, %494 : vector<1x256xf32>
    %c3_218 = arith.constant 3 : index
    %c1_219 = arith.constant 1 : index
    %497 = memref.load %arg8[%c3_218, %c1_219] : memref<4x4xf32, #tpu.memory_space<smem>>
    %498 = vector.extract_strided_slice %335 {offsets = [5, 0], sizes = [1, 256], strides = [1, 1]} : vector<8x256xf32> to vector<1x256xf32>
    %499 = vector.broadcast %497 : f32 to vector<1x256xf32>
    %500 = arith.mulf %499, %498 : vector<1x256xf32>
    %501 = arith.addf %496, %500 : vector<1x256xf32>
    %c3_220 = arith.constant 3 : index
    %c2_221 = arith.constant 2 : index
    %502 = memref.load %arg8[%c3_220, %c2_221] : memref<4x4xf32, #tpu.memory_space<smem>>
    %503 = vector.extract_strided_slice %335 {offsets = [6, 0], sizes = [1, 256], strides = [1, 1]} : vector<8x256xf32> to vector<1x256xf32>
    %504 = vector.broadcast %502 : f32 to vector<1x256xf32>
    %505 = arith.mulf %504, %503 : vector<1x256xf32>
    %506 = arith.addf %501, %505 : vector<1x256xf32>
    %c3_222 = arith.constant 3 : index
    %c3_223 = arith.constant 3 : index
    %507 = memref.load %arg8[%c3_222, %c3_223] : memref<4x4xf32, #tpu.memory_space<smem>>
    %508 = vector.extract_strided_slice %335 {offsets = [7, 0], sizes = [1, 256], strides = [1, 1]} : vector<8x256xf32> to vector<1x256xf32>
    %509 = vector.broadcast %507 : f32 to vector<1x256xf32>
    %510 = arith.mulf %509, %508 : vector<1x256xf32>
    %511 = arith.addf %506, %510 : vector<1x256xf32>
    %512 = tpu.concatenate %357, %379, %401, %423, %445, %467, %489, %511 in 0 : vector<1x256xf32>, vector<1x256xf32>, vector<1x256xf32>, vector<1x256xf32>, vector<1x256xf32>, vector<1x256xf32>, vector<1x256xf32>, vector<1x256xf32> -> vector<8x256xf32>
    %513 = arith.addf %512, %0 : vector<8x256xf32>
    %c0_224 = arith.constant 0 : index
    %c0_225 = arith.constant 0 : index
    %514 = vector.load %arg10[%c0_224, %c0_225] : memref<8x256xf32, #tpu.memory_space<vmem>>, vector<8x256xf32>
    tpu.vector_store %arg10[%c0_224, %c0_225], %513 {strides = array<i32>} : memref<8x256xf32, #tpu.memory_space<vmem>>, vector<8x256xf32>,
    return
  }
  func.func @transform_0(%arg0: i32) -> (i32, i32) {
    %c0_i32 = arith.constant 0 : i32
    %c0_i32_0 = arith.constant 0 : i32
    return %arg0, %c0_i32 : i32, i32
  }
  func.func @transform_1(%arg0: i32) -> (i32, i32, i32) {
    %c0_i32 = arith.constant 0 : i32
    %c0_i32_0 = arith.constant 0 : i32
    %c0_i32_1 = arith.constant 0 : i32
    %c0_i32_2 = arith.constant 0 : i32
    return %c0_i32, %c0_i32_0, %c0_i32_1 : i32, i32, i32
  }
  func.func @transform_2(%arg0: i32) -> (i32, i32, i32) {
    %c0_i32 = arith.constant 0 : i32
    %c0_i32_0 = arith.constant 0 : i32
    %c0_i32_1 = arith.constant 0 : i32
    %c0_i32_2 = arith.constant 0 : i32
    return %c0_i32, %c0_i32_0, %c0_i32_1 : i32, i32, i32
  }
  func.func @transform_3(%arg0: i32) -> (i32, i32, i32) {
    %c0_i32 = arith.constant 0 : i32
    %c0_i32_0 = arith.constant 0 : i32
    %c0_i32_1 = arith.constant 0 : i32
    %c0_i32_2 = arith.constant 0 : i32
    return %c0_i32, %c0_i32_0, %c0_i32_1 : i32, i32, i32
  }
  func.func @transform_4(%arg0: i32) -> (i32, i32) {
    %c0_i32 = arith.constant 0 : i32
    %c0_i32_0 = arith.constant 0 : i32
    %c0_i32_1 = arith.constant 0 : i32
    return %c0_i32, %c0_i32_0 : i32, i32
  }
  func.func @transform_5(%arg0: i32) -> i32 {
    %c0_i32 = arith.constant 0 : i32
    %c0_i32_0 = arith.constant 0 : i32
    return %c0_i32 : i32
  }
  func.func @transform_6(%arg0: i32) -> i32 {
    %c0_i32 = arith.constant 0 : i32
    %c0_i32_0 = arith.constant 0 : i32
    return %c0_i32 : i32
  }
  func.func @transform_7(%arg0: i32) -> (i32, i32) {
    %c0_i32 = arith.constant 0 : i32
    %c0_i32_0 = arith.constant 0 : i32
    %c0_i32_1 = arith.constant 0 : i32
    return %c0_i32, %c0_i32_0 : i32, i32
  }
  func.func @transform_8(%arg0: i32) -> i32 {
    %c0_i32 = arith.constant 0 : i32
    %c0_i32_0 = arith.constant 0 : i32
    return %c0_i32 : i32
  }
  func.func @transform_9(%arg0: i32) -> (i32, i32) {
    %c0_i32 = arith.constant 0 : i32
    %c0_i32_0 = arith.constant 0 : i32
    return %arg0, %c0_i32 : i32, i32
  }
}

</mosaic_0001>

<bundles_post_ra>
// kernel: tpu_custom_call.1
= control target key start
LH: loop header
LB: loop body
LE: loop exit
PB: predicated region body
PF: predicated region fallthrough
CT: control target
= control target key end

     0   :  { %15 = vsyncpa [#allocation5], 0  ;;  %s1852_s0 = inlined_call_operand.vmem [shape: f32[8,256], index: 0, kind: input, shape index: {}]   ;;  %s1853_s1 = inlined_call_operand.vmem [shape: f32[9,8,1], index: 1, kind: input, shape index: {}]   ;;  %s1854_s2 = inlined_call_operand.vmem [shape: f32[9,8,1], index: 2, kind: input, shape index: {}]   ;;  %s1855_s3 = inlined_call_operand.vmem [shape: f32[9,1,256], index: 3, kind: input, shape index: {}]   ;;  %s1856_s4 = inlined_call_operand.vmem [shape: f32[4,4], index: 4, kind: input, shape index: {}]   ;;  %s1857_s5 = inlined_call_operand.vmem [shape: f32[4], index: 5, kind: input, shape index: {}]   ;;  %s1858_s6 = inlined_call_operand.<no memory space> [shape: f32[1], index: 6, kind: input, shape index: {}]   ;;  %s1859_s7 = inlined_call_operand.vmem [shape: f32[4,4], index: 7, kind: input, shape index: {}]   ;;  %s1860_s8 = inlined_call_operand.vmem [shape: f32[4], index: 8, kind: input, shape index: {}]   ;;  %s1861_s9 = inlined_call_operand.hbm [shape: f32[8,256], index: 9, kind: output, shape index: {}]  }
   0x1   :  { %16 = vsyncpa [#allocation7], 0 }
   0x2   :  { %17 = vsyncpa [#allocation10], 0  ;;  %s43_s11 = sshll.u32 %s1857_s5, 4  ;;  %s44_s11 = int_to_ptr.vmem [resolvable:$true] %s43_s11 }
   0x3   :  { %18 = vsyncpa [#allocation4], 0  ;;  %s33_s14 = sshll.u32 %s1856_s4, 4  ;;  %s1046_s15 = scalar_lea.vmem %s44_s11, 16  ;;  %s34_s14 = int_to_ptr.vmem [resolvable:$true] %s33_s14 }
   0x4   :  { %p1047_p0 = scmp.ne.s32.totalorder %s44_s11, %s1046_s15  ;;  %p1051_p1 = scmp.lt.s32.totalorder %s44_s11, %s44_s11 }
   0x5   :  { %p1052_p2 = scmp.lt.s32.totalorder %s1046_s15, %s1046_s15 }
   0x7   :  { %p1053_p3 = por %p1052_p2, %p1051_p1 }
   0x9   :  { %p1054_p4 = pnand %p1053_p3, %p1047_p0 }
   0xb   :  { %1057 = shalt.err (!%p1054_p4)
}
   0xc   :  { %s1122_s16 = smov [#allocation6]   ;;  %s1058_s17 = scalar_lea.vmem %s34_s14, 64 }
   0xd   :  { %46 = dma.vmem_to_smem %s44_s11, 16, %s1122_s16, [#allocation7]  }
   0xe   :  { %p1059_p5 = scmp.ne.s32.totalorder %s34_s14, %s1058_s17  ;;  %p1063_p6 = scmp.lt.s32.totalorder %s34_s14, %s34_s14 }
   0xf   :  { %p1064_p7 = scmp.lt.s32.totalorder %s1058_s17, %s1058_s17 }
  0x11   :  { %p1065_p8 = por %p1064_p7, %p1063_p6 }
  0x13   :  { %p1066_p9 = pnand %p1065_p8, %p1059_p5 }
  0x15   :  { %1069 = shalt.err (!%p1066_p9)
}
  0x16   :  { %s1123_s5 = smov [#allocation3]   ;;  %s55_s19 = sshll.u32 %s1859_s7, 4  ;;  %s56_s19 = int_to_ptr.vmem [resolvable:$true] %s55_s19 }
  0x17   :  { %36 = dma.vmem_to_smem %s34_s14, 64, %s1123_s5, [#allocation5]  }
  0x18   :  { %s65_s22 = sshll.u32 %s1860_s8, 4  ;;  %s1070_s23 = scalar_lea.vmem %s56_s19, 64  ;;  %s66_s22 = int_to_ptr.vmem [resolvable:$true] %s65_s22 }
  0x19   :  { %p1071_p10 = scmp.ne.s32.totalorder %s56_s19, %s1070_s23  ;;  %p1075_p11 = scmp.lt.s32.totalorder %s56_s19, %s56_s19 }
  0x1a   :  { %p1076_p12 = scmp.lt.s32.totalorder %s1070_s23, %s1070_s23 }
  0x1c   :  { %p1077_p13 = por %p1076_p12, %p1075_p11 }
  0x1e   :  { %p1078_p0 = pnand %p1077_p13, %p1071_p10 }
  0x20   :  { %1081 = shalt.err (!%p1078_p0)
}
  0x21   :  { %s1124_s24 = smov [#allocation8]   ;;  %s1082_s25 = scalar_lea.vmem %s66_s22, 16 }
  0x22   :  { %58 = dma.vmem_to_smem %s56_s19, 64, %s1124_s24, [#allocation7]  }
  0x23   :  { %p1083_p1 = scmp.ne.s32.totalorder %s66_s22, %s1082_s25  ;;  %p1087_p2 = scmp.lt.s32.totalorder %s66_s22, %s66_s22 }
  0x24   :  { %p1088_p3 = scmp.lt.s32.totalorder %s1082_s25, %s1082_s25 }
  0x26   :  { %p1089_p4 = por %p1088_p3, %p1087_p2 }
  0x28   :  { %p1090_p5 = pnand %p1089_p4, %p1083_p1 }
  0x2a   :  { %1093 = shalt.err (!%p1090_p5)
}
  0x2b   :  { %s1125_s7 = smov [#allocation9]  }
  0x2c   :  { %68 = dma.vmem_to_smem %s66_s22, 16, %s1125_s7, [#allocation10]  }
  0x2d   :  { %1114 = dma.done.wait [#allocation5], 64  }
  0x2e   :  { %1115 = vsyncadd [#allocation5], 4294967232 }
  0x2f   :  { %1116 = dma.done.wait [#allocation7], 80  }
  0x30   :  { %1117 = vsyncadd [#allocation7], 4294967216 }
  0x31   :  { %1118 = dma.done.wait [#allocation10], 16  }
  0x32   :  { %1119 = vsyncadd [#allocation10], 4294967280 }
  0x33   :  { %81 = sfence }
  0x34   :  { %v1201_v0 = vld [vmem:[%s1852_s0] sm:$0xff]  ;;  %v1126_v2 = vmov 0   ;;  %s1127_s29 = smov 17   ;;  %v1211_v3 = vld [vmem:[%s1852_s0 + $0x8] sm:$0xff]  ;;  %s1128_s13 = smov 16   ;;  %v977_v5 = vld [vmem:[%s1853_s1 + $0x10] sm:$0xff]  ;;  %v104_v29 = vlaneseq }
  0x35   :  { %v122_v1 = vld [vmem:[%s1853_s1] sm:$0xff]  ;;  %1042 = vset.pattern.permute.xlu0 %v1126_v2  ;;  %100 = vrot.lane.b32.xlu1 %v1201_v0, %s1127_s29  ;;  %v976_v4 = vld [vmem:[%s1853_s1 + $0x8] sm:$0xff]  ;;  %s1129_s16 = smov 15   ;;  %v978_v6 = vld [vmem:[%s1853_s1 + $0x18] sm:$0xff]  ;;  %s1130_s4 = smov 1   ;;  %vm552_vm8 = vcmask 1040384  }
  0x36   :  { %125 = vperm.xlu0 %1042, %v122_v1   ;;  %1043 = vset.pattern.permute.xlu1 %v1126_v2  ;;  %v980_v7 = vld [vmem:[%s1853_s1 + $0x28] sm:$0xff]  ;;  %v979_v8 = vld [vmem:[%s1853_s1 + $0x20] sm:$0xff]  ;;  %s1131_s22 = smov 127   ;;  %v981_v9 = vld [vmem:[%s1853_s1 + $0x30] sm:$0xff]  ;;  %s1132_s25 = smov 113   ;;  %v111_v32 = vshrl.u32 %v104_v29, 7 }
  0x37   :  { %v982_v10 = vld [vmem:[%s1853_s1 + $0x38] sm:$0xff]  ;;  %s1133_s26 = smov 112   ;;  %v983_v11 = vld [vmem:[%s1853_s1 + $0x40] sm:$0xff]  ;;  %s1134_s30 = smov 111   ;;  %v1003_v13 = vld [vmem:[%s1854_s2 + $0x10] sm:$0xff]  ;;  %v1300_v35 = vand.u32 127, %v104_v29 }
  0x38   :  { %v588_v12 = vld [vmem:[%s1854_s2] sm:$0xff]  ;;  %v1002_v14 = vld [vmem:[%s1854_s2 + $0x8] sm:$0xff]  ;;  %v1004_v16 = vld [vmem:[%s1854_s2 + $0x18] sm:$0xff]  ;;  %v1302_v36 = vsub.s32 0, %v111_v32  ;;  %v1312_v40 = vsub.s32 1, %v111_v32  ;;  %s1348_s5 = sld [smem:[#allocation3]] }
  0x39   :  { %102 = vrot.lane.b32.xlu1 %v1211_v3, %s1127_s29  ;;  %v1005_v15 = vld [vmem:[%s1854_s2 + $0x20] sm:$0xff]  ;;  %v1007_v17 = vld [vmem:[%s1854_s2 + $0x30] sm:$0xff]  ;;  %v1006_v18 = vld [vmem:[%s1854_s2 + $0x28] sm:$0xff]  ;;  %vm134_vm0 = vcmp.lt.s32.totalorder %v1300_v35, 16  ;;  %vm165_vm1 = vcmp.lt.s32.totalorder %v1300_v35, 15  ;;  %vm106_vm2 = vcmp.lt.s32.totalorder %v1300_v35, 17 }
  0x3a   :  { %154 = vperm.xlu0 %1042, %v976_v4   ;;  %v1009_v19 = vld [vmem:[%s1854_s2 + $0x40] sm:$0xff]  ;;  %v1008_v20 = vld [vmem:[%s1854_s2 + $0x38] sm:$0xff]  ;;  %vm196_vm3 = vcmp.lt.s32.totalorder %v1300_v35, 1  ;;  %s1360_s18 = sld [smem:[#allocation3 + $0x1]]  ;;  %vm238_vm4 = vcmp.lt.s32.totalorder %v1300_v35, 127  ;;  %vm269_vm5 = vcmp.lt.s32.totalorder %v1300_v35, 113 }
  0x3b   :  { %v969_v37 = vld [vmem:[%s1855_s3 + $0x2] sm:$0x3]  ;;  %v84_v39 = vld [vmem:[%s1855_s3] sm:$0x3]  ;;  %v970_v42 = vld [vmem:[%s1855_s3 + $0x4] sm:$0x3] }
  0x3c   :  { %v1321_v43 = vrot.slane %v969_v37, %v1302_v36  ;;  %v1324_v44 = vrot.slane %v969_v37, %v1312_v40  ;;  %v971_v45 = vld [vmem:[%s1855_s3 + $0x6] sm:$0x3]  ;;  %v1332_v46 = vrot.slane %v84_v39, %v1302_v36  ;;  %v1339_v50 = vrot.slane %v84_v39, %v1312_v40  ;;  %s1368_s19 = sld [smem:[#allocation6]] }
  0x3d   :  { %132 = vrot.lane.b32.xlu1 %v1211_v3, %s1128_s13  ;;  %v1342_v51 = vrot.slane %v970_v42, %v1302_v36  ;;  %v1345_v52 = vrot.slane %v970_v42, %v1312_v40  ;;  %v1355_v56 = vrot.slane %v971_v45, %v1302_v36  ;;  %v1358_v57 = vrot.slane %v971_v45, %v1312_v40  ;;  %s1374_s20 = sld [smem:[#allocation3 + $0x2]] }
  0x3e   :  { %130 = vrot.lane.b32.xlu0 %v1201_v0, %s1128_s13  ;;  %s1386_s8 = sld [smem:[#allocation3 + $0x3]]  ;;  %vm300_vm6 = vcmp.lt.s32.totalorder %v1300_v35, 112  ;;  %vm331_vm7 = vcmp.lt.s32.totalorder %v1300_v35, 111  ;;  %vm555_vm9 = vcmask 1041408   ;;  %vm1862_vm10 = vcmask 1042432  }
  0x3f   :  { %s1391_s27 = sld [smem:[#allocation6 + $0x1]]  ;;  %vm561_vm11 = vcmask 1043456   ;;  %vm564_vm12 = vcmask 1044480   ;;  %vm567_vm13 = vcmask 1045504   ;;  %vm570_vm14 = vcmask 1046528  }
  0x40   :  { %s1395_s28 = sld [smem:[#allocation3 + $0x80]] }
  0x41   :  { %161 = vrot.lane.b32.xlu1 %v1201_v0, %s1129_s16  ;;  %s1409_s2 = sld [smem:[#allocation3 + $0x81]] }
  0x42   :  { %185 = vperm.xlu0 %1042, %v977_v5   ;;  %v972_v5 = vld [vmem:[%s1855_s3 + $0xa] sm:$0x3]  ;;  %s1418_s12 = sld [smem:[#allocation3 + $0x82]] }
  0x43   :  { %s1428_s14 = sld [smem:[#allocation3 + $0x83]] }
  0x44   :  { %s1432_s15 = sld [smem:[#allocation6 + $0x2]] }
  0x45   :  { %216 = vperm.xlu1 %1043, %v978_v6   ;;  %s1444_s17 = sld [smem:[#allocation3 + $0x100]] }
  0x46   :  { %163 = vrot.lane.b32.xlu0 %v1211_v3, %s1129_s16  ;;  %s1448_s1 = sld [smem:[#allocation3 + $0x101]] }
  0x47   :  { %s1458_s21 = sld [smem:[#allocation3 + $0x102]] }
  0x48   :  { %s1465_s7 = sld [smem:[#allocation3 + $0x103]] }
  0x49   :  { %194 = vrot.lane.b32.xlu1 %v1211_v3, %s1130_s4  ;;  %s1467_s10 = sld [smem:[#allocation6 + $0x3]] }
  0x4a   :  { %192 = vrot.lane.b32.xlu0 %v1201_v0, %s1130_s4  ;;  %s1473_s11 = sld [smem:[#allocation3 + $0x180]] }
  0x4b   :  { %s1486_s23 = sld [smem:[#allocation3 + $0x182]] }
  0x4c   :  { %s1492_s24 = sld [smem:[#allocation3 + $0x183]] }
  0x4d   :  { %258 = vperm.xlu1 %1043, %v980_v7   ;;  %v973_v7 = vld [vmem:[%s1855_s3 + $0xc] sm:$0x3] }
  0x4e   :  { %227 = vperm.xlu0 %1042, %v979_v8  }
  0x51   :  { %236 = vrot.lane.b32.xlu1 %v1211_v3, %s1131_s22 }
  0x52   :  { %234 = vrot.lane.b32.xlu0 %v1201_v0, %s1131_s22 }
  0x55   :  { %265 = vrot.lane.b32.xlu1 %v1201_v0, %s1132_s25 }
  0x56   :  { %289 = vperm.xlu0 %1042, %v981_v9  }
  0x59   :  { %320 = vperm.xlu1 %1043, %v982_v10  }
  0x5a   :  { %267 = vrot.lane.b32.xlu0 %v1211_v3, %s1132_s25 }
  0x5d   :  { %298 = vrot.lane.b32.xlu1 %v1211_v3, %s1133_s26 }
  0x5e   :  { %296 = vrot.lane.b32.xlu0 %v1201_v0, %s1133_s26 }
  0x61   :  { %327 = vrot.lane.b32.xlu1 %v1201_v0, %s1134_s30 }
  0x62   :  { %351 = vperm.xlu0 %1042, %v983_v11  }
  0x65   :  { %591 = vperm.xlu1 %1043, %v588_v12  }
  0x66   :  { %329 = vrot.lane.b32.xlu0 %v1211_v3, %s1134_s30 }
  0x69   :  { %627 = vperm.xlu1 %1043, %v1003_v13  }
  0x6a   :  { %608 = vperm.xlu0 %1042, %v1002_v14   ;;  %v1398_v14 = vrot.slane %v972_v5, %v1302_v36 }
  0x6d   :  { %657 = vperm.xlu1 %1043, %v1005_v15   ;;  %v1401_v15 = vrot.slane %v972_v5, %v1312_v40 }
  0x6e   :  { %646 = vperm.xlu0 %1042, %v1004_v16  }
  0x71   :  { %695 = vperm.xlu1 %1043, %v1007_v17   ;;  %v1407_v17 = vrot.slane %v973_v7, %v1302_v36 }
  0x72   :  { %676 = vperm.xlu0 %1042, %v1006_v18  }
  0x75   :  { %733 = vperm.xlu1 %1043, %v1009_v19  }
  0x76   :  { %714 = vperm.xlu0 %1042, %v1008_v20  }
  0xa7   :  { %v101_v21 = vpop.permute.xlu1 %100 }
  0xab   :  { %v103_v23 = vpop.permute.xlu1 %102 }
  0xac   :  { %v107_v58 = vsel %vm106_vm2, %v101_v21, %v103_v23  ;;  %v108_v59 = vsel %vm106_vm2, %v103_v23, %v101_v21 }
  0xad   :  { %v120_v8 = vmul.f32 %v1332_v46, %v108_v59  ;;  %v121_v9 = vmul.f32 %v1339_v50, %v107_v58 }
  0xaf   :  { %v133_v25 = vpop.permute.xlu1 %132 }
  0xb1   :  { %v1294_v22 = vpop.permute.xlu0 %125 }
  0xb2   :  { %v128_v18 = vmul.f32 %v1294_v22, %v120_v8  ;;  %v129_v19 = vmul.f32 %v1294_v22, %v121_v9  ;;  %v360_v9 = vstv %s1348_s5 }
  0xb3   :  { %v162_v27 = vpop.permute.xlu1 %161 }
  0xb5   :  { %v155_v24 = vpop.permute.xlu0 %154 }
  0xb9   :  { %v131_v26 = vpop.permute.xlu0 %130 }
  0xba   :  { %v135_v47 = vsel %vm134_vm0, %v131_v26, %v133_v25  ;;  %v136_v48 = vsel %vm134_vm0, %v133_v25, %v131_v26 }
  0xbb   :  { %v148_v60 = vmul.f32 %v1321_v43, %v136_v48  ;;  %v149_v61 = vmul.f32 %v1324_v44, %v135_v47 }
  0xbd   :  { %v1296_v28 = vpop.permute.xlu0 %185  ;;  %v157_v10 = vmul.f32 %v155_v24, %v148_v60  ;;  %v158_v11 = vmul.f32 %v155_v24, %v149_v61  ;;  %v974_v24 = vld [vmem:[%s1855_s3 + $0xe] sm:$0x3] }
  0xbe   :  { %v1439_v37 = vrot.slane %v974_v24, %v1302_v36  ;;  %v1442_v39 = vrot.slane %v974_v24, %v1312_v40  ;;  %v404_v24 = vstv %s1395_s28  ;;  %s1705_s28 = sld [smem:[#allocation8 + $0x102]] }
  0xbf   :  { %v159_v22 = vadd.f32 %v157_v10, %v128_v18  ;;  %v363_v10 = vstv %s1368_s19  ;;  %s1691_s19 = sld [smem:[#allocation8 + $0x83]] }
  0xc0   :  { %v1298_v30 = vpop.permute.xlu1 %216 }
  0xc1   :  { %v164_v31 = vpop.permute.xlu0 %163 }
  0xc2   :  { %v166_v54 = vsel %vm165_vm1, %v162_v27, %v164_v31  ;;  %v167_v55 = vsel %vm165_vm1, %v164_v31, %v162_v27  ;;  %v1425_v27 = vrot.slane %v973_v7, %v1312_v40 }
  0xc3   :  { %v179_v2 = vmul.f32 %v1342_v51, %v167_v55  ;;  %v180_v4 = vmul.f32 %v1345_v52, %v166_v54 }
  0xc4   :  { %v195_v33 = vpop.permute.xlu1 %194 }
  0xc5   :  { %v193_v34 = vpop.permute.xlu0 %192  ;;  %v188_v20 = vmul.f32 %v1296_v28, %v179_v2  ;;  %v189_v21 = vmul.f32 %v1296_v28, %v180_v4  ;;  %v160_v28 = vadd.f32 %v158_v11, %v129_v19  ;;  %v367_v11 = vstv %s1360_s18 }
  0xc6   :  { %v197_v62 = vsel %vm196_vm3, %v193_v34, %v195_v33  ;;  %v198_v63 = vsel %vm196_vm3, %v195_v33, %v193_v34 }
  0xc7   :  { %v210_v12 = vmul.f32 %v1355_v56, %v198_v63  ;;  %v211_v13 = vmul.f32 %v1358_v57, %v197_v62  ;;  %v190_v42 = vadd.f32 %v188_v20, %v159_v22  ;;  %v191_v45 = vadd.f32 %v189_v21, %v160_v28 }
  0xc8   :  { %v1307_v38 = vpop.permute.xlu1 %258  ;;  %v407_v28 = vstv %s1391_s27  ;;  %s1699_s27 = sld [smem:[#allocation8 + $0x101]] }
  0xc9   :  { %v1315_v41 = vpop.permute.xlu0 %227  ;;  %v219_v29 = vmul.f32 %v1298_v30, %v210_v12  ;;  %v220_v31 = vmul.f32 %v1298_v30, %v211_v13 }
  0xcb   :  { %v221_v58 = vadd.f32 %v219_v29, %v190_v42  ;;  %v222_v59 = vadd.f32 %v220_v31, %v191_v45  ;;  %v411_v29 = vstv %s1409_s2  ;;  %v423_v31 = vstv %s1418_s12  ;;  %s1713_s2 = sld [smem:[#allocation8 + $0x103]] }
  0xcc   :  { %v237_v49 = vpop.permute.xlu1 %236  ;;  %s1715_s12 = sld [smem:[#allocation9 + $0x3]] }
  0xcd   :  { %v235_v53 = vpop.permute.xlu0 %234 }
  0xce   :  { %v239_v25 = vsel %vm238_vm4, %v235_v53, %v237_v49  ;;  %v240_v26 = vsel %vm238_vm4, %v237_v49, %v235_v53  ;;  %v230_v49 = vmul.f32 %v1315_v41, %v1201_v0  ;;  %v231_v53 = vmul.f32 %v1315_v41, %v1211_v3  ;;  %v975_v0 = vld [vmem:[%s1855_s3 + $0x10] sm:$0x3]  ;;  %s1482_s3 = sld [smem:[#allocation3 + $0x181]] }
  0xcf   :  { %v252_v30 = vmul.f32 %v1398_v14, %v239_v25  ;;  %v253_v47 = vmul.f32 %v1401_v15, %v240_v26  ;;  %v1477_v2 = vrot.slane %v975_v0, %v1302_v36  ;;  %v1480_v4 = vrot.slane %v975_v0, %v1312_v40 }
  0xd0   :  { %v266_v1 = vpop.permute.xlu1 %265  ;;  %v233_v5 = vadd.f32 %v231_v53, %v222_v59  ;;  %v379_v36 = vstv %s1374_s20  ;;  %v495_v59 = vstv %s1467_s10  ;;  %v523_v0 = vstv %s1492_s24  ;;  %s1693_s20 = sld [smem:[#allocation9 + $0x2]] }
  0xd1   :  { %v1381_v6 = vpop.permute.xlu0 %289  ;;  %v261_v3 = vmul.f32 %v1307_v38, %v252_v30  ;;  %v262_v41 = vmul.f32 %v1307_v38, %v253_v47  ;;  %v232_v38 = vadd.f32 %v230_v49, %v221_v58  ;;  %v448_v30 = vstv %s1444_s17  ;;  %s1731_s17 = sld [smem:[#allocation8 + $0x182]] }
  0xd2   :  { %v451_v47 = vstv %s1432_s15  ;;  %v467_v49 = vstv %s1458_s21  ;;  %v492_v58 = vstv %s1473_s11  ;;  %s1725_s15 = sld [smem:[#allocation8 + $0x181]]  ;;  %s1135_s21 = smov [#allocation11]  }
  0xd3   :  { %v263_v40 = vadd.f32 %v261_v3, %v232_v38  ;;  %v264_v12 = vadd.f32 %v262_v41, %v233_v5 }
  0xd4   :  { %v1403_v16 = vpop.permute.xlu1 %320 }
  0xd5   :  { %v268_v23 = vpop.permute.xlu0 %267 }
  0xd6   :  { %v270_v32 = vsel %vm269_vm5, %v266_v1, %v268_v23  ;;  %v271_v33 = vsel %vm269_vm5, %v268_v23, %v266_v1  ;;  %v391_v23 = vstv %s1386_s8  ;;  %s1695_s8 = sld [smem:[#allocation8 + $0x100]] }
  0xd7   :  { %v283_v60 = vmul.f32 %v1407_v17, %v270_v32  ;;  %v284_v61 = vmul.f32 %v1425_v27, %v271_v33  ;;  %v435_v32 = vstv %s1428_s14  ;;  %s1719_s14 = sld [smem:[#allocation8 + $0x180]] }
  0xd8   :  { %v299_v34 = vpop.permute.xlu1 %298 }
  0xd9   :  { %v297_v48 = vpop.permute.xlu0 %296  ;;  %v292_v7 = vmul.f32 %v1381_v6, %v283_v60  ;;  %v293_v8 = vmul.f32 %v1381_v6, %v284_v61  ;;  %v499_v60 = vstv %s1482_s3  ;;  %v511_v61 = vstv %s1486_s23 }
  0xda   :  { %v301_v54 = vsel %vm300_vm6, %v297_v48, %v299_v34  ;;  %v302_v55 = vsel %vm300_vm6, %v299_v34, %v297_v48  ;;  %v455_v48 = vstv %s1448_s1  ;;  %s1737_s1 = sld [smem:[#allocation8 + $0x183]] }
  0xdb   :  { %v314_v62 = vmul.f32 %v1439_v37, %v301_v54  ;;  %v315_v63 = vmul.f32 %v1442_v39, %v302_v55  ;;  %v294_v25 = vadd.f32 %v292_v7, %v263_v40  ;;  %v295_v26 = vadd.f32 %v293_v8, %v264_v12 }
  0xdc   :  { %v328_v6 = vpop.permute.xlu1 %327  ;;  %v479_v55 = vstv %s1465_s7  ;;  %s958_s7 = sshll.u32 %s1135_s21, 4  ;;  %s959_s7 = int_to_ptr.vmem [resolvable:$true] %s958_s7 }
  0xdd   :  { %v352_v1 = vpop.permute.xlu0 %351  ;;  %v323_v13 = vmul.f32 %v1403_v16, %v314_v62  ;;  %v324_v18 = vmul.f32 %v1403_v16, %v315_v63  ;;  %s1094_s24 = scalar_lea.vmem %s959_s7, 256  ;;  %p1099_p7 = scmp.lt.s32.totalorder %s959_s7, %s959_s7 }
  0xde   :  { %p1095_p6 = scmp.ne.s32.totalorder %s959_s7, %s1094_s24  ;;  %p1100_p8 = scmp.lt.s32.totalorder %s1094_s24, %s1094_s24 }
  0xdf   :  { %v325_v33 = vadd.f32 %v323_v13, %v294_v25  ;;  %v326_v34 = vadd.f32 %v324_v18, %v295_v26 }
  0xe0   :  { %p1101_p9 = por %p1100_p8, %p1099_p7 }
  0xe1   :  { %v330_v19 = vpop.permute.xlu0 %329 }
  0xe2   :  { %v332_v20 = vsel %vm331_vm7, %v328_v6, %v330_v19  ;;  %v333_v21 = vsel %vm331_vm7, %v330_v19, %v328_v6  ;;  %p1102_p10 = pnand %p1101_p9, %p1095_p6 }
  0xe3   :  { %v345_v22 = vmul.f32 %v1477_v2, %v332_v20  ;;  %v346_v16 = vmul.f32 %v1480_v4, %v333_v21 }
  0xe5   :  { %v354_v42 = vmul.f32 %v352_v1, %v345_v22  ;;  %v355_v45 = vmul.f32 %v352_v1, %v346_v16 }
  0xe7   :  { %v1512_v53 = vadd.f32 %v354_v42, %v325_v33  ;;  %v1514_v54 = vadd.f32 %v355_v45, %v326_v34 }
  0xe9   :  { %v361_v3 = vmul.f32 %v360_v9, %v1512_v53  ;;  %v362_v41 = vmul.f32 %v360_v9, %v1514_v54  ;;  %v368_v62 = vmul.f32 %v367_v11, %v1512_v53  ;;  %v369_v63 = vmul.f32 %v367_v11, %v1514_v54 }
  0xea   :  { %v380_v1 = vmul.f32 %v379_v36, %v1512_v53  ;;  %v381_v38 = vmul.f32 %v379_v36, %v1514_v54  ;;  %v392_v5 = vmul.f32 %v391_v23, %v1512_v53  ;;  %v393_v7 = vmul.f32 %v391_v23, %v1514_v54 }
  0xeb   :  { %v364_v8 = vadd.f32 %v363_v10, %v361_v3  ;;  %v365_v40 = vadd.f32 %v363_v10, %v362_v41  ;;  %v372_v12 = vrot.slane %v368_v62, 1  ;;  %v373_v13 = vrot.slane %v369_v63, 1 }
  0xec   :  { %v384_v18 = vrot.slane %v380_v1, 2  ;;  %v385_v6 = vrot.slane %v381_v38, 2  ;;  %v396_v19 = vrot.slane %v392_v5, 3  ;;  %v397_v9 = vrot.slane %v393_v7, 3 }
  0xed   :  { %v376_v20 = vadd.f32 %v372_v12, %v364_v8  ;;  %v377_v21 = vadd.f32 %v373_v13, %v365_v40  ;;  %v405_v11 = vmul.f32 %v404_v24, %v1512_v53  ;;  %v406_v25 = vmul.f32 %v404_v24, %v1514_v54 }
  0xee   :  { %v412_v36 = vmul.f32 %v411_v29, %v1512_v53  ;;  %v413_v26 = vmul.f32 %v411_v29, %v1514_v54  ;;  %v424_v23 = vmul.f32 %v423_v31, %v1512_v53  ;;  %v425_v10 = vmul.f32 %v423_v31, %v1514_v54 }
  0xef   :  { %v388_v22 = vadd.f32 %v384_v18, %v376_v20  ;;  %v389_v16 = vadd.f32 %v385_v6, %v377_v21  ;;  %v408_v33 = vadd.f32 %v407_v28, %v405_v11  ;;  %v409_v34 = vadd.f32 %v407_v28, %v406_v25 }
  0xf0   :  { %v416_v42 = vrot.slane %v412_v36, 1  ;;  %v417_v45 = vrot.slane %v413_v26, 1  ;;  %v428_v3 = vrot.slane %v424_v23, 2  ;;  %v429_v41 = vrot.slane %v425_v10, 2 }
  0xf1   :  { %v1536_v62 = vadd.f32 %v396_v19, %v388_v22  ;;  %v1538_v63 = vadd.f32 %v397_v9, %v389_v16  ;;  %v436_v24 = vmul.f32 %v435_v32, %v1512_v53  ;;  %v437_v29 = vmul.f32 %v435_v32, %v1514_v54 }
  0xf2   :  { %v420_v1 = vadd.f32 %v416_v42, %v408_v33  ;;  %v421_v38 = vadd.f32 %v417_v45, %v409_v34  ;;  %v449_v31 = vmul.f32 %v448_v30, %v1512_v53  ;;  %v450_v5 = vmul.f32 %v448_v30, %v1514_v54 }
  0xf3   :  { %v440_v7 = vrot.slane %v436_v24, 3  ;;  %v441_v28 = vrot.slane %v437_v29, 3  ;;  %v456_v8 = vmul.f32 %v455_v48, %v1512_v53  ;;  %v457_v40 = vmul.f32 %v455_v48, %v1514_v54 }
  0xf4   :  { %v432_v12 = vadd.f32 %v428_v3, %v420_v1  ;;  %v433_v13 = vadd.f32 %v429_v41, %v421_v38  ;;  %v452_v18 = vadd.f32 %v451_v47, %v449_v31  ;;  %v453_v6 = vadd.f32 %v451_v47, %v450_v5 }
  0xf5   :  { %v460_v19 = vrot.slane %v456_v8, 1  ;;  %v461_v32 = vrot.slane %v457_v40, 1  ;;  %v468_v9 = vmul.f32 %v467_v49, %v1512_v53  ;;  %v469_v20 = vmul.f32 %v467_v49, %v1514_v54 }
  0xf6   :  { %v444_v30 = vadd.f32 %v440_v7, %v432_v12  ;;  %v445_v21 = vadd.f32 %v441_v28, %v433_v13  ;;  %v480_v48 = vmul.f32 %v479_v55, %v1512_v53  ;;  %v481_v11 = vmul.f32 %v479_v55, %v1514_v54 }
  0xf7   :  { %v464_v47 = vadd.f32 %v460_v19, %v452_v18  ;;  %v465_v25 = vadd.f32 %v461_v32, %v453_v6  ;;  %v472_v36 = vrot.slane %v468_v9, 2  ;;  %v473_v26 = vrot.slane %v469_v20, 2 }
  0xf8   :  { %v484_v23 = vrot.slane %v480_v48, 3  ;;  %v485_v10 = vrot.slane %v481_v11, 3  ;;  %v493_v49 = vmul.f32 %v492_v58, %v1512_v53  ;;  %v494_v22 = vmul.f32 %v492_v58, %v1514_v54 }
  0xf9   :  { %v476_v16 = vadd.f32 %v472_v36, %v464_v47  ;;  %v477_v33 = vadd.f32 %v473_v26, %v465_v25  ;;  %v500_v55 = vmul.f32 %v499_v60, %v1512_v53  ;;  %v501_v34 = vmul.f32 %v499_v60, %v1514_v54 }
  0xfa   :  { %v496_v42 = vadd.f32 %v495_v59, %v493_v49  ;;  %v497_v45 = vadd.f32 %v495_v59, %v494_v22  ;;  %v512_v3 = vmul.f32 %v511_v61, %v1512_v53  ;;  %v513_v41 = vmul.f32 %v511_v61, %v1514_v54 }
  0xfb   :  { %v488_v58 = vadd.f32 %v484_v23, %v476_v16  ;;  %v489_v24 = vadd.f32 %v485_v10, %v477_v33  ;;  %v504_v29 = vrot.slane %v500_v55, 1  ;;  %v505_v1 = vrot.slane %v501_v34, 1  ;;  %v592_v55 = vpop.permute.xlu1 %591 }
  0xfc   :  { %v516_v38 = vrot.slane %v512_v3, 2  ;;  %v517_v31 = vrot.slane %v513_v41, 2  ;;  %v524_v5 = vmul.f32 %v523_v0, %v1512_v53  ;;  %v525_v60 = vmul.f32 %v523_v0, %v1514_v54 }
  0xfd   :  { %v508_v7 = vadd.f32 %v504_v29, %v496_v42  ;;  %v509_v59 = vadd.f32 %v505_v1, %v497_v45  ;;  %v536_v28 = vrot.slane %v444_v30, 7  ;;  %v537_v8 = vrot.slane %v445_v21, 7  ;;  %v609_v42 = vpop.permute.xlu0 %608 }
  0xfe   :  { %v528_v40 = vrot.slane %v524_v5, 3  ;;  %v529_v12 = vrot.slane %v525_v60, 3  ;;  %v542_v13 = vrot.slane %v488_v58, 6  ;;  %v543_v61 = vrot.slane %v489_v24, 6 }
  0xff   :  { %v520_v18 = vadd.f32 %v516_v38, %v508_v7  ;;  %v521_v6 = vadd.f32 %v517_v31, %v509_v59  ;;  %v553_v19 = vsel %vm552_vm8, %v1536_v62, %v536_v28  ;;  %v554_v32 = vsel %vm552_vm8, %v1538_v63, %v537_v8  ;;  %v628_v34 = vpop.permute.xlu1 %627 }
 0x100   :  { %v556_v54 = vsel %vm555_vm9, %v553_v19, %v542_v13  ;;  %v557_v0 = vsel %vm555_vm9, %v554_v32, %v543_v61  ;;  %v575_v26 = vstv %s1858_s6  ;;  %s1655_s6 = sld [smem:[#allocation9]] }
 0x101   :  { %v532_v53 = vadd.f32 %v528_v40, %v520_v18  ;;  %v533_v9 = vadd.f32 %v529_v12, %v521_v6  ;;  %v647_v3 = vpop.permute.xlu0 %646 }
 0x103   :  { %v548_v20 = vrot.slane %v532_v53, 5  ;;  %v549_v30 = vrot.slane %v533_v9, 5  ;;  %v1635_v45 = vpop.permute.xlu1 %657 }
 0x105   :  { %v559_v21 = vsel %vm1862_vm10, %v556_v54, %v548_v20  ;;  %v560_v48 = vsel %vm1862_vm10, %v557_v0, %v549_v30  ;;  %v1639_v58 = vpop.permute.xlu0 %676 }
 0x106   :  { %v562_v11 = vsel %vm561_vm11, %v559_v21, %v1536_v62  ;;  %v563_v47 = vsel %vm561_vm11, %v560_v48, %v1538_v63 }
 0x107   :  { %v565_v25 = vsel %vm564_vm12, %v562_v11, %v536_v28  ;;  %v566_v36 = vsel %vm564_vm12, %v563_v47, %v537_v8  ;;  %v1637_v41 = vpop.permute.xlu1 %695 }
 0x108   :  { %v568_v23 = vsel %vm567_vm13, %v565_v25, %v542_v13  ;;  %v569_v10 = vsel %vm567_vm13, %v566_v36, %v543_v61 }
 0x109   :  { %v571_v49 = vsel %vm570_vm14, %v568_v23, %v548_v20  ;;  %v572_v62 = vsel %vm570_vm14, %v569_v10, %v549_v30  ;;  %v1643_v29 = vpop.permute.xlu0 %714 }
 0x10a   :  { %vm573_vm15 = vcmp.ge.f32.partialorder %v571_v49, 0.0  ;;  %vm574_vm10 = vcmp.ge.f32.partialorder %v572_v62, 0.0  ;;  %v576_v63 = vmul.f32 %v575_v26, %v571_v49  ;;  %v577_v22 = vmul.f32 %v575_v26, %v572_v62 }
 0x10b   :  { %v1641_v24 = vpop.permute.xlu1 %733 }
 0x10c   :  { %v1599_v16 = vsel %vm573_vm15, %v571_v49, %v576_v63  ;;  %v1601_v33 = vsel %vm574_vm10, %v572_v62, %v577_v22 }
 0x10d   :  { %582 = vrot.lane.b32.xlu0 %v1601_v33, %s1127_s29  ;;  %580 = vrot.lane.b32.xlu1 %v1599_v16, %s1127_s29  ;;  %s1663_s29 = sld [smem:[#allocation8]] }
 0x111   :  { %598 = vrot.lane.b32.xlu0 %v1601_v33, %s1128_s13  ;;  %596 = vrot.lane.b32.xlu1 %v1599_v16, %s1128_s13  ;;  %s1667_s13 = sld [smem:[#allocation8 + $0x1]] }
 0x115   :  { %615 = vrot.lane.b32.xlu0 %v1599_v16, %s1129_s16  ;;  %617 = vrot.lane.b32.xlu1 %v1601_v33, %s1129_s16  ;;  %s1669_s16 = sld [smem:[#allocation8 + $0x2]] }
 0x119   :  { %636 = vrot.lane.b32.xlu0 %v1601_v33, %s1130_s4  ;;  %634 = vrot.lane.b32.xlu1 %v1599_v16, %s1130_s4  ;;  %s1671_s4 = sld [smem:[#allocation8 + $0x3]] }
 0x11d   :  { %666 = vrot.lane.b32.xlu0 %v1601_v33, %s1131_s22  ;;  %664 = vrot.lane.b32.xlu1 %v1599_v16, %s1131_s22  ;;  %s1677_s22 = sld [smem:[#allocation9 + $0x1]] }
 0x121   :  { %683 = vrot.lane.b32.xlu0 %v1599_v16, %s1132_s25  ;;  %685 = vrot.lane.b32.xlu1 %v1601_v33, %s1132_s25  ;;  %s1681_s25 = sld [smem:[#allocation8 + $0x80]] }
 0x125   :  { %704 = vrot.lane.b32.xlu0 %v1601_v33, %s1133_s26  ;;  %702 = vrot.lane.b32.xlu1 %v1599_v16, %s1133_s26  ;;  %s1683_s26 = sld [smem:[#allocation8 + $0x81]] }
 0x129   :  { %721 = vrot.lane.b32.xlu0 %v1599_v16, %s1134_s30  ;;  %723 = vrot.lane.b32.xlu1 %v1601_v33, %s1134_s30  ;;  %s1685_s30 = sld [smem:[#allocation8 + $0x82]] }
 0x12f   :  { %v805_v35 = vstv %s1685_s30 }
 0x17f   :  { %v583_v1 = vpop.permute.xlu0 %582  ;;  %v581_v38 = vpop.permute.xlu1 %580 }
 0x180   :  { %v584_v59 = vsel %vm106_vm2, %v581_v38, %v583_v1  ;;  %v585_v28 = vsel %vm106_vm2, %v583_v1, %v581_v38  ;;  %v660_v1 = vmul.f32 %v1635_v45, %v1599_v16 }
 0x181   :  { %v586_v61 = vmul.f32 %v585_v28, %v1332_v46  ;;  %v587_v18 = vmul.f32 %v584_v59, %v1339_v50 }
 0x183   :  { %v599_v31 = vpop.permute.xlu0 %598  ;;  %v597_v5 = vpop.permute.xlu1 %596  ;;  %v594_v9 = vmul.f32 %v592_v55, %v586_v61  ;;  %v595_v54 = vmul.f32 %v592_v55, %v587_v18 }
 0x184   :  { %v600_v60 = vsel %vm134_vm0, %v597_v5, %v599_v31  ;;  %v601_v7 = vsel %vm134_vm0, %v599_v31, %v597_v5  ;;  %vm1863_vm0 = vcmask 1042432  }
 0x185   :  { %v602_v8 = vmul.f32 %v601_v7, %v1321_v43  ;;  %v603_v40 = vmul.f32 %v600_v60, %v1324_v44 }
 0x187   :  { %v616_v12 = vpop.permute.xlu0 %615  ;;  %v618_v13 = vpop.permute.xlu1 %617  ;;  %v611_v32 = vmul.f32 %v609_v42, %v602_v8  ;;  %v612_v46 = vmul.f32 %v609_v42, %v603_v40  ;;  %v742_v8 = vstv %s1663_s29  ;;  %v745_v40 = vstv %s1655_s6 }
 0x188   :  { %v619_v6 = vsel %vm165_vm1, %v616_v12, %v618_v13  ;;  %v620_v19 = vsel %vm165_vm1, %v618_v13, %v616_v12  ;;  %v749_v12 = vstv %s1667_s13  ;;  %v761_v13 = vstv %s1669_s16  ;;  %vm1864_vm1 = vmmov %vm1863_vm0 }
 0x189   :  { %v621_v43 = vmul.f32 %v620_v19, %v1342_v51  ;;  %v622_v44 = vmul.f32 %v619_v6, %v1345_v52  ;;  %v613_v48 = vadd.f32 %v611_v32, %v594_v9  ;;  %v614_v11 = vadd.f32 %v612_v46, %v595_v54 }
 0x18a   :  { %v789_v32 = vstv %s1677_s22  ;;  %v786_v9 = vstv %s1681_s25  ;;  %v793_v54 = vstv %s1683_s26 }
 0x18b   :  { %v637_v53 = vpop.permute.xlu0 %636  ;;  %v635_v50 = vpop.permute.xlu1 %634  ;;  %v630_v52 = vmul.f32 %v628_v34, %v621_v43  ;;  %v631_v20 = vmul.f32 %v628_v34, %v622_v44  ;;  %v773_v44 = vstv %s1671_s4 }
 0x18c   :  { %v638_v0 = vsel %vm196_vm3, %v635_v50, %v637_v53  ;;  %v639_v51 = vsel %vm196_vm3, %v637_v53, %v635_v50 }
 0x18d   :  { %v640_v30 = vmul.f32 %v639_v51, %v1355_v56  ;;  %v641_v21 = vmul.f32 %v638_v0, %v1358_v57  ;;  %v632_v57 = vadd.f32 %v630_v52, %v613_v48  ;;  %v633_v10 = vadd.f32 %v631_v20, %v614_v11 }
 0x18e   :  { %v817_v0 = vstv %s1691_s19  ;;  %v837_v48 = vstv %s1699_s27  ;;  %v849_v11 = vstv %s1705_s28 }
 0x18f   :  { %v649_v47 = vmul.f32 %v647_v3, %v640_v30  ;;  %v650_v25 = vmul.f32 %v647_v3, %v641_v21  ;;  %v667_v36 = vpop.permute.xlu0 %666  ;;  %v665_v26 = vpop.permute.xlu1 %664  ;;  %v830_v21 = vstv %s1695_s8 }
 0x190   :  { %v668_v23 = vsel %vm238_vm4, %v665_v26, %v667_v36  ;;  %v669_v56 = vsel %vm238_vm4, %v667_v36, %v665_v26  ;;  %v877_v36 = vstv %s1715_s12  ;;  %v874_v26 = vstv %s1719_s14 }
 0x191   :  { %v651_v49 = vadd.f32 %v649_v47, %v632_v57  ;;  %v652_v62 = vadd.f32 %v650_v25, %v633_v10  ;;  %v670_v63 = vmul.f32 %v668_v23, %v1398_v14  ;;  %v671_v22 = vmul.f32 %v669_v56, %v1401_v15 }
 0x192   :  { %v661_v14 = vmul.f32 %v1635_v45, %v1601_v33  ;;  %v861_v25 = vstv %s1713_s2  ;;  %v881_v23 = vstv %s1725_s15  ;;  %v893_v56 = vstv %s1731_s17 }
 0x193   :  { %v684_v55 = vpop.permute.xlu0 %683  ;;  %v686_v34 = vpop.permute.xlu1 %685  ;;  %v662_v31 = vadd.f32 %v660_v1, %v651_v49  ;;  %v679_v60 = vmul.f32 %v1639_v58, %v670_v63  ;;  %v680_v16 = vmul.f32 %v1639_v58, %v671_v22  ;;  %v905_v57 = vstv %s1737_s1 }
 0x194   :  { %v687_v42 = vsel %vm269_vm5, %v684_v55, %v686_v34  ;;  %v688_v3 = vsel %vm269_vm5, %v686_v34, %v684_v55  ;;  %v663_v5 = vadd.f32 %v661_v14, %v652_v62 }
 0x195   :  { %v689_v15 = vmul.f32 %v687_v42, %v1407_v17  ;;  %v690_v38 = vmul.f32 %v688_v3, %v1425_v27  ;;  %v681_v61 = vadd.f32 %v679_v60, %v662_v31 }
 0x196   :  { %v682_v18 = vadd.f32 %v680_v16, %v663_v5 }
 0x197   :  { %v705_v7 = vpop.permute.xlu0 %704  ;;  %v703_v33 = vpop.permute.xlu1 %702  ;;  %v698_v45 = vmul.f32 %v1637_v41, %v689_v15  ;;  %v699_v59 = vmul.f32 %v1637_v41, %v690_v38 }
 0x198   :  { %v706_v17 = vsel %vm300_vm6, %v703_v33, %v705_v7  ;;  %v707_v27 = vsel %vm300_vm6, %v705_v7, %v703_v33 }
 0x199   :  { %v708_v28 = vmul.f32 %v706_v17, %v1439_v37  ;;  %v709_v58 = vmul.f32 %v707_v27, %v1442_v39  ;;  %v700_v46 = vadd.f32 %v698_v45, %v681_v61  ;;  %v701_v53 = vadd.f32 %v699_v59, %v682_v18 }
 0x19b   :  { %v717_v37 = vmul.f32 %v1643_v29, %v708_v28  ;;  %v718_v41 = vmul.f32 %v1643_v29, %v709_v58  ;;  %v722_v39 = vpop.permute.xlu0 %721  ;;  %v724_v6 = vpop.permute.xlu1 %723 }
 0x19c   :  { %v725_v19 = vsel %vm331_vm7, %v722_v39, %v724_v6  ;;  %v726_v43 = vsel %vm331_vm7, %v724_v6, %v722_v39 }
 0x19d   :  { %v727_v50 = vmul.f32 %v725_v19, %v1477_v2  ;;  %v728_v29 = vmul.f32 %v726_v43, %v1480_v4  ;;  %v719_v51 = vadd.f32 %v717_v37, %v700_v46  ;;  %v720_v52 = vadd.f32 %v718_v41, %v701_v53 }
 0x19e   :  { %v833_v2 = vstv %s1693_s20 }
 0x19f   :  { %v736_v20 = vmul.f32 %v1641_v24, %v727_v50  ;;  %v737_v30 = vmul.f32 %v1641_v24, %v728_v29 }
 0x1a1   :  { %v1759_v4 = vadd.f32 %v736_v20, %v719_v51  ;;  %v1761_v47 = vadd.f32 %v737_v30, %v720_v52 }
 0x1a3   :  { %v743_v10 = vmul.f32 %v742_v8, %v1759_v4  ;;  %v744_v49 = vmul.f32 %v742_v8, %v1761_v47  ;;  %v750_v24 = vmul.f32 %v749_v12, %v1759_v4  ;;  %v751_v62 = vmul.f32 %v749_v12, %v1761_v47 }
 0x1a4   :  { %v762_v63 = vmul.f32 %v761_v13, %v1759_v4  ;;  %v763_v22 = vmul.f32 %v761_v13, %v1761_v47  ;;  %v774_v55 = vmul.f32 %v773_v44, %v1759_v4  ;;  %v775_v34 = vmul.f32 %v773_v44, %v1761_v47 }
 0x1a5   :  { %v746_v42 = vadd.f32 %v745_v40, %v743_v10  ;;  %v747_v3 = vadd.f32 %v745_v40, %v744_v49  ;;  %v754_v1 = vrot.slane %v750_v24, 1  ;;  %v755_v14 = vrot.slane %v751_v62, 1 }
 0x1a6   :  { %v766_v15 = vrot.slane %v762_v63, 2  ;;  %v767_v38 = vrot.slane %v763_v22, 2  ;;  %v778_v31 = vrot.slane %v774_v55, 3  ;;  %v779_v5 = vrot.slane %v775_v34, 3 }
 0x1a7   :  { %v758_v60 = vadd.f32 %v754_v1, %v746_v42  ;;  %v759_v16 = vadd.f32 %v755_v14, %v747_v3  ;;  %v787_v7 = vmul.f32 %v786_v9, %v1759_v4  ;;  %v788_v33 = vmul.f32 %v786_v9, %v1761_v47 }
 0x1a8   :  { %v794_v17 = vmul.f32 %v793_v54, %v1759_v4  ;;  %v795_v27 = vmul.f32 %v793_v54, %v1761_v47  ;;  %v806_v45 = vmul.f32 %v805_v35, %v1759_v4  ;;  %v807_v59 = vmul.f32 %v805_v35, %v1761_v47 }
 0x1a9   :  { %v770_v28 = vadd.f32 %v766_v15, %v758_v60  ;;  %v771_v58 = vadd.f32 %v767_v38, %v759_v16  ;;  %v790_v8 = vadd.f32 %v789_v32, %v787_v7  ;;  %v791_v40 = vadd.f32 %v789_v32, %v788_v33 }
 0x1aa   :  { %v798_v12 = vrot.slane %v794_v17, 1  ;;  %v799_v13 = vrot.slane %v795_v27, 1  ;;  %v810_v61 = vrot.slane %v806_v45, 2  ;;  %v811_v18 = vrot.slane %v807_v59, 2 }
 0x1ab   :  { %v1783_v37 = vadd.f32 %v778_v31, %v770_v28  ;;  %v1785_v41 = vadd.f32 %v779_v5, %v771_v58  ;;  %v818_v39 = vmul.f32 %v817_v0, %v1759_v4  ;;  %v819_v6 = vmul.f32 %v817_v0, %v1761_v47 }
 0x1ac   :  { %v802_v19 = vadd.f32 %v798_v12, %v790_v8  ;;  %v803_v43 = vadd.f32 %v799_v13, %v791_v40  ;;  %v831_v44 = vmul.f32 %v830_v21, %v1759_v4  ;;  %v832_v46 = vmul.f32 %v830_v21, %v1761_v47 }
 0x1ad   :  { %v822_v53 = vrot.slane %v818_v39, 3  ;;  %v823_v32 = vrot.slane %v819_v6, 3  ;;  %v838_v50 = vmul.f32 %v837_v48, %v1759_v4  ;;  %v839_v29 = vmul.f32 %v837_v48, %v1761_v47 }
 0x1ae   :  { %v814_v9 = vadd.f32 %v810_v61, %v802_v19  ;;  %v815_v54 = vadd.f32 %v811_v18, %v803_v43  ;;  %v834_v35 = vadd.f32 %v833_v2, %v831_v44  ;;  %v835_v51 = vadd.f32 %v833_v2, %v832_v46 }
 0x1af   :  { %v842_v52 = vrot.slane %v838_v50, 1  ;;  %v843_v0 = vrot.slane %v839_v29, 1  ;;  %v850_v20 = vmul.f32 %v849_v11, %v1759_v4  ;;  %v851_v30 = vmul.f32 %v849_v11, %v1761_v47 }
 0x1b0   :  { %v826_v21 = vadd.f32 %v822_v53, %v814_v9  ;;  %v827_v10 = vadd.f32 %v823_v32, %v815_v54  ;;  %v862_v48 = vmul.f32 %v861_v25, %v1759_v4  ;;  %v863_v49 = vmul.f32 %v861_v25, %v1761_v47 }
 0x1b1   :  { %v846_v2 = vadd.f32 %v842_v52, %v834_v35  ;;  %v847_v24 = vadd.f32 %v843_v0, %v835_v51  ;;  %v854_v62 = vrot.slane %v850_v20, 2  ;;  %v855_v63 = vrot.slane %v851_v30, 2 }
 0x1b2   :  { %v866_v22 = vrot.slane %v862_v48, 3  ;;  %v867_v55 = vrot.slane %v863_v49, 3  ;;  %v875_v11 = vmul.f32 %v874_v26, %v1759_v4  ;;  %v876_v34 = vmul.f32 %v874_v26, %v1761_v47 }
 0x1b3   :  { %v858_v42 = vadd.f32 %v854_v62, %v846_v2  ;;  %v859_v3 = vadd.f32 %v855_v63, %v847_v24  ;;  %v882_v25 = vmul.f32 %v881_v23, %v1759_v4  ;;  %v883_v1 = vmul.f32 %v881_v23, %v1761_v47 }
 0x1b4   :  { %v878_v14 = vadd.f32 %v877_v36, %v875_v11  ;;  %v879_v15 = vadd.f32 %v877_v36, %v876_v34  ;;  %v894_v38 = vmul.f32 %v893_v56, %v1759_v4  ;;  %v895_v31 = vmul.f32 %v893_v56, %v1761_v47 }
 0x1b5   :  { %v870_v26 = vadd.f32 %v866_v22, %v858_v42  ;;  %v871_v5 = vadd.f32 %v867_v55, %v859_v3  ;;  %v886_v60 = vrot.slane %v882_v25, 1  ;;  %v887_v16 = vrot.slane %v883_v1, 1 }
 0x1b6   :  { %v898_v7 = vrot.slane %v894_v38, 2  ;;  %v899_v33 = vrot.slane %v895_v31, 2  ;;  %v906_v17 = vmul.f32 %v905_v57, %v1759_v4  ;;  %v907_v23 = vmul.f32 %v905_v57, %v1761_v47 }
 0x1b7   :  { %v890_v27 = vadd.f32 %v886_v60, %v878_v14  ;;  %v891_v36 = vadd.f32 %v887_v16, %v879_v15  ;;  %v918_v45 = vrot.slane %v826_v21, 7  ;;  %v919_v59 = vrot.slane %v827_v10, 7 }
 0x1b8   :  { %v910_v28 = vrot.slane %v906_v17, 3  ;;  %v911_v58 = vrot.slane %v907_v23, 3  ;;  %v924_v8 = vrot.slane %v870_v26, 6  ;;  %v925_v56 = vrot.slane %v871_v5, 6 }
 0x1b9   :  { %v902_v40 = vadd.f32 %v898_v7, %v890_v27  ;;  %v903_v12 = vadd.f32 %v899_v33, %v891_v36  ;;  %v934_v13 = vsel %vm552_vm8, %v1783_v37, %v918_v45  ;;  %v935_v61 = vsel %vm552_vm8, %v1785_v41, %v919_v59 }
 0x1ba   :  { %v936_v47 = vsel %vm555_vm9, %v934_v13, %v924_v8  ;;  %v937_v57 = vsel %vm555_vm9, %v935_v61, %v925_v56 }
 0x1bb   :  { %v914_v4 = vadd.f32 %v910_v28, %v902_v40  ;;  %v915_v18 = vadd.f32 %v911_v58, %v903_v12 }
 0x1bd   :  { %v930_v39 = vrot.slane %v914_v4, 5  ;;  %v931_v6 = vrot.slane %v915_v18, 5 }
 0x1bf   :  { %v938_v19 = vsel %vm1863_vm0, %v936_v47, %v930_v39  ;;  %v939_v43 = vsel %vm1864_vm1, %v937_v57, %v931_v6 }
 0x1c0   :  { %v940_v44 = vsel %vm561_vm11, %v938_v19, %v1783_v37  ;;  %v941_v46 = vsel %vm561_vm11, %v939_v43, %v1785_v41  ;;  %v1044_v37 = vld [vmem:[%s1852_s0] sm:$0xff]  ;;  %v1045_v41 = vld [vmem:[%s1852_s0 + $0x8] sm:$0xff] }
 0x1c1   :  { %v942_v53 = vsel %vm564_vm12, %v940_v44, %v918_v45  ;;  %v943_v32 = vsel %vm564_vm12, %v941_v46, %v919_v59 }
 0x1c2   :  { %v944_v50 = vsel %vm567_vm13, %v942_v53, %v924_v8  ;;  %v945_v29 = vsel %vm567_vm13, %v943_v32, %v925_v56 }
 0x1c3   :  { %v946_v9 = vsel %vm570_vm14, %v944_v50, %v930_v39  ;;  %v947_v54 = vsel %vm570_vm14, %v945_v29, %v931_v6 }
 0x1c4   :  { %v948_v35 = vadd.f32 %v1044_v37, %v946_v9  ;;  %v949_v51 = vadd.f32 %v1045_v41, %v947_v54 }
 0x1c6   :  { %950 = vst [vmem:[#allocation11] sm:$0xff] %v948_v35  ;;  %951 = vst [vmem:[#allocation11 + $0x8] sm:$0xff] %v949_v51 }
 0x1c7   :  { %1105 = shalt.err (!%p1102_p10)
}
 0x1c8   :  { %961 = dma.vmem_to_hbm [thread:$0]  %s959_s7, 256, %s1861_s9, [#allocation4]  }
 0x1c9   :  { %1120 = dma.done.wait [#allocation4], 256  }
 0x1ca   :  { %1121 = vsyncadd [#allocation4], 4294967040 }
 0x1cb   :  { %965 = vsyncpa [#allocation4], 1 }
 0x1cc   :  { %966 = vsyncpa [#allocation5], 1 }
 0x1cd   :  { %967 = vsyncpa [#allocation7], 1 }
 0x1ce   :  { %968 = vsyncpa [#allocation10], 1 }

</bundles_post_ra>
